<compile_context>
chip_gen: v5e
topology: v5e:2x2
jax: 0.10.0
libtpu: 0.0.40
codegen_flags: <defaults>
</compile_context>

<pallas_src>
import functools

import jax
import jax.numpy as jnp
import numpy as np
from jax.experimental import pallas as pl
from jax.experimental.pallas import tpu as pltpu

BN_EPS = 1e-5  # PyTorch nn.BatchNorm2d default eps


# ----------------------------------------------------------------------------
# Fused kernel: 3 banded MXU matmuls (= conv3x3) + BN(batch stats) + residual
# ----------------------------------------------------------------------------
def _resnet_block_kernel(xh_ref, bw_ref, proj_ref, gamma_ref, beta_ref, o_ref,
                         *, n, h, wc, inv_count):
    """xh_ref:    (N, H+2, W*C) f32   H-padded activation, W folded into lanes
       bw_ref:    (3, W*C, W*C) bf16  block-banded conv weights, one per kh row
       proj_ref:  (W*C, W*C)    f32   channel projector kron(ones(W,W), I_C)
       gamma_ref: (1, W*C)      f32   BN weight tiled across W groups
       beta_ref:  (1, W*C)      f32   BN bias tiled across W groups
       o_ref:     (N*H, W*C)    f32   x + BN(conv3x3(x))  (lane-dense)
    """
    m = n * h

    # Shifted row slabs of the single VMEM-resident padded activation.
    # The center slab (kh=1) doubles as the residual (kept in f32, exact).
    top   = xh_ref[:, 0:h, :].reshape(m, wc)           # kh = 0 (aligned slice)
    resid = xh_ref[:, 1:1 + h, :].reshape(m, wc)       # kh = 1 == residual
    bot   = xh_ref[:, 2:2 + h, :].reshape(m, wc)       # kh = 2

    # 3x3 conv == 3 lane-dense (N*H, W*C) @ (W*C, W*C) banded matmuls.
    # bf16 operands (MXU-native), f32 accumulation.
    acc = jnp.dot(top.astype(jnp.bfloat16), bw_ref[0],
                  preferred_element_type=jnp.float32)
    acc = acc + jnp.dot(resid.astype(jnp.bfloat16), bw_ref[1],
                        preferred_element_type=jnp.float32)
    acc = acc + jnp.dot(bot.astype(jnp.bfloat16), bw_ref[2],
                        preferred_element_type=jnp.float32)

    # Training-mode BatchNorm2d: per-channel mean / biased variance over
    # N*H*W, computed entirely in the lane-dense layout:
    #   1. sublane reduction over the N*H rows            -> (1, W*C)
    #   2. fold the W groups + broadcast back via `proj`  -> (1, W*C)
    colsum = jnp.sum(acc, axis=0, keepdims=True)                         # (1, W*C)
    mean_wc = jnp.dot(colsum, proj_ref[...],
                      preferred_element_type=jnp.float32) * inv_count
    centered = acc - mean_wc
    sqsum = jnp.sum(centered * centered, axis=0, keepdims=True)          # (1, W*C)
    var_wc = jnp.dot(sqsum, proj_ref[...],
                     preferred_element_type=jnp.float32) * inv_count
    scale_wc = gamma_ref[...] * jax.lax.rsqrt(var_wc + BN_EPS)

    # Fused BN affine + residual add; lane-dense unmasked store.
    o_ref[...] = resid + centered * scale_wc + beta_ref[...]


# ----------------------------------------------------------------------------
# NHWC-native wrapper (no layout transposes): use this if the graph is NHWC.
# ----------------------------------------------------------------------------
def resnet_block_forward_nhwc(x_nhwc, conv_w_oihw, gamma, beta):
    n, h, w, c = x_nhwc.shape
    kh, kw = conv_w_oihw.shape[2], conv_w_oihw.shape[3]
    assert (kh, kw) == (3, 3)
    wc = w * c
    m = n * h

    # Fold W into the lane axis and add only the tiny H halo (W padding is
    # folded into the banded weights below).
    x_rows = x_nhwc.reshape(n, h, wc).astype(jnp.float32)
    xh = jnp.pad(x_rows, ((0, 0), (1, 1), (0, 0)))                # (N, H+2, W*C)

    # (Cout, Cin, KH, KW) -> (KH, KW, Cin, Cout)
    w_kkio = jnp.transpose(conv_w_oihw, (2, 3, 1, 0)).astype(jnp.float32)

    # Block-banded weights: B[kh][p*C+ci, q*C+co] = w[kh, kw, ci, co] iff
    # p == q + kw - 1 (band truncation == implicit zero padding in W).
    shifts = jnp.stack([jnp.eye(w, k=1 - dj, dtype=jnp.float32)
                        for dj in range(3)])                      # (3, W, W)
    bweights = jnp.einsum("dpq,edio->epiqo", shifts, w_kkio)      # (3,W,C,W,C)
    bweights = bweights.reshape(3, wc, wc).astype(jnp.bfloat16)

    # Channel projector: sums each channel over its W groups and broadcasts
    # the result back across W (used for the BN mean/var fold in-kernel).
    proj = jnp.kron(jnp.ones((w, w), jnp.float32),
                    jnp.eye(c, dtype=jnp.float32))                # (W*C, W*C)

    gamma_wc = jnp.tile(gamma.astype(jnp.float32), w).reshape(1, wc)
    beta_wc = jnp.tile(beta.astype(jnp.float32), w).reshape(1, wc)

    # VMEM budget sized from the actual footprint (with generous headroom),
    # kept well below v7x's 64 MiB physical ceiling.
    io_bytes = (xh.size * 4 + bweights.size * 2 + proj.size * 4
                + gamma_wc.size * 4 + beta_wc.size * 4 + m * wc * 4)
    vmem_limit = int(min(max(8 * io_bytes, 4 * 1024 * 1024), 64 * 1024 * 1024))

    cost = pl.CostEstimate(
        flops=int(2 * 3 * m * wc * wc + 2 * 2 * wc * wc + 10 * m * wc),
        transcendentals=int(wc),
        bytes_accessed=int(io_bytes),
    )

    kernel = functools.partial(
        _resnet_block_kernel,
        n=n, h=h, wc=wc, inv_count=1.0 / float(n * h * w))

    out_flat = pl.pallas_call(
        kernel,
        out_shape=jax.ShapeDtypeStruct((m, wc), jnp.float32),
        in_specs=[pl.BlockSpec(memory_space=pltpu.MemorySpace.VMEM)] * 5,
        out_specs=pl.BlockSpec(memory_space=pltpu.MemorySpace.VMEM),
        compiler_params=pltpu.CompilerParams(vmem_limit_bytes=vmem_limit),
        cost_estimate=cost,
    )(xh, bweights, proj, gamma_wc, beta_wc)

    return out_flat.reshape(n, h, w, c)


# ----------------------------------------------------------------------------
# PyTorch-convention wrapper: NCHW in / NCHW out.
# ----------------------------------------------------------------------------
def resnet_block_forward(x_nchw, conv_w_oihw, gamma, beta):
    x_nhwc = jnp.transpose(x_nchw, (0, 2, 3, 1))
    out_nhwc = resnet_block_forward_nhwc(x_nhwc, conv_w_oihw, gamma, beta)
    return jnp.transpose(out_nhwc, (0, 3, 1, 2))


# ----------------------------------------------------------------------------
# Demo + correctness check against a pure-JAX reference
# ----------------------------------------------------------------------------
if __name__ == "__main__":
    key = jax.random.PRNGKey(0)
    k_x, k_w = jax.random.split(key)

    # ResnetBlock(conv_dim=16) on a batch=2, 16x16 feature map.
    N, C, H, W = 2, 16, 16, 16
    x = jax.random.normal(k_x, (N, C, H, W), jnp.float32)
    fan_in = C * 3 * 3
    conv_w = jax.random.normal(k_w, (C, C, 3, 3), jnp.float32) / jnp.sqrt(float(fan_in))
    gamma = jnp.ones((C,), jnp.float32)   # fresh BatchNorm2d weight
    beta = jnp.zeros((C,), jnp.float32)   # fresh BatchNorm2d bias

    fwd = jax.jit(resnet_block_forward)
    out = jax.block_until_ready(fwd(x, conv_w, gamma, beta))

    # Pure-JAX reference: out = x + BN_train(Conv2d_3x3_s1_p1(x))
    y = jax.lax.conv_general_dilated(
        x, conv_w, window_strides=(1, 1), padding=((1, 1), (1, 1)),
        dimension_numbers=("NCHW", "OIHW", "NCHW"))
    mu = jnp.mean(y, axis=(0, 2, 3), keepdims=True)
    var = jnp.mean((y - mu) ** 2, axis=(0, 2, 3), keepdims=True)
    ref = (x + (y - mu) * jax.lax.rsqrt(var + BN_EPS) * gamma[None, :, None, None]
           + beta[None, :, None, None])

    assert out.shape == (N, C, H, W), out.shape
    assert out.dtype == jnp.float32
    assert bool(jnp.all(jnp.isfinite(out)))
    # bf16 matmul operands (f32 accumulation) => ~1e-2-level deviation budget.
    np.testing.assert_allclose(np.asarray(out), np.asarray(ref),
                               atol=3e-2, rtol=3e-2)
    print("KERNEL_OK")
</pallas_src>

<mosaic_0001>
module attributes {stable_mosaic.version = 11 : i64} {
  func.func @_resnet_block_kernel(%arg0: memref<2x18x256xf32, #tpu.memory_space<vmem>>, %arg1: memref<3x256x256xbf16, #tpu.memory_space<vmem>>, %arg2: memref<256x256xf32, #tpu.memory_space<vmem>>, %arg3: memref<1x256xf32, #tpu.memory_space<vmem>>, %arg4: memref<1x256xf32, #tpu.memory_space<vmem>>, %arg5: memref<32x256xf32, #tpu.memory_space<vmem>>) attributes {dimension_semantics = [], scalar_prefetch = 0 : i64, scratch_operands = 0 : i64, tpu.core_type = #tpu.core_type<tc>} {
    %c0 = arith.constant 0 : index
    %c0_0 = arith.constant 0 : index
    %c0_1 = arith.constant 0 : index
    %0 = vector.load %arg0[%c0, %c0_0, %c0_1] : memref<2x18x256xf32, #tpu.memory_space<vmem>>, vector<2x16x256xf32>
    %1 = vector.shape_cast %0 : vector<2x16x256xf32> to vector<32x256xf32>
    %c0_2 = arith.constant 0 : index
    %c1 = arith.constant 1 : index
    %c0_3 = arith.constant 0 : index
    %2 = vector.load %arg0[%c0_2, %c1, %c0_3] : memref<2x18x256xf32, #tpu.memory_space<vmem>>, vector<2x16x256xf32>
    %3 = vector.shape_cast %2 : vector<2x16x256xf32> to vector<32x256xf32>
    %c0_4 = arith.constant 0 : index
    %c2 = arith.constant 2 : index
    %c0_5 = arith.constant 0 : index
    %4 = vector.load %arg0[%c0_4, %c2, %c0_5] : memref<2x18x256xf32, #tpu.memory_space<vmem>>, vector<2x16x256xf32>
    %5 = vector.shape_cast %4 : vector<2x16x256xf32> to vector<32x256xf32>
    %6 = arith.truncf %1 : vector<32x256xf32> to vector<32x256xbf16>
    %c0_6 = arith.constant 0 : index
    %c0_7 = arith.constant 0 : index
    %c0_8 = arith.constant 0 : index
    %7 = vector.load %arg1[%c0_6, %c0_7, %c0_8] : memref<3x256x256xbf16, #tpu.memory_space<vmem>>, vector<1x256x256xbf16>
    %8 = vector.shape_cast %7 : vector<1x256x256xbf16> to vector<256x256xbf16>
    %cst = arith.constant dense<0.000000e+00> : vector<32x256xf32>
    %9 = tpu.matmul %6, %8, %cst {dimension_numbers = #tpu.dot_dimension_numbers<[1], [0], [0], [1], [0, 0, 1, 1], [], []>} : vector<32x256xbf16>, vector<256x256xbf16>, vector<32x256xf32> -> vector<32x256xf32>
    %10 = arith.truncf %3 : vector<32x256xf32> to vector<32x256xbf16>
    %c1_9 = arith.constant 1 : index
    %c0_10 = arith.constant 0 : index
    %c0_11 = arith.constant 0 : index
    %11 = vector.load %arg1[%c1_9, %c0_10, %c0_11] : memref<3x256x256xbf16, #tpu.memory_space<vmem>>, vector<1x256x256xbf16>
    %12 = vector.shape_cast %11 : vector<1x256x256xbf16> to vector<256x256xbf16>
    %cst_12 = arith.constant dense<0.000000e+00> : vector<32x256xf32>
    %13 = tpu.matmul %10, %12, %cst_12 {dimension_numbers = #tpu.dot_dimension_numbers<[1], [0], [0], [1], [0, 0, 1, 1], [], []>} : vector<32x256xbf16>, vector<256x256xbf16>, vector<32x256xf32> -> vector<32x256xf32>
    %14 = arith.addf %9, %13 : vector<32x256xf32>
    %15 = arith.truncf %5 : vector<32x256xf32> to vector<32x256xbf16>
    %c2_13 = arith.constant 2 : index
    %c0_14 = arith.constant 0 : index
    %c0_15 = arith.constant 0 : index
    %16 = vector.load %arg1[%c2_13, %c0_14, %c0_15] : memref<3x256x256xbf16, #tpu.memory_space<vmem>>, vector<1x256x256xbf16>
    %17 = vector.shape_cast %16 : vector<1x256x256xbf16> to vector<256x256xbf16>
    %cst_16 = arith.constant dense<0.000000e+00> : vector<32x256xf32>
    %18 = tpu.matmul %15, %17, %cst_16 {dimension_numbers = #tpu.dot_dimension_numbers<[1], [0], [0], [1], [0, 0, 1, 1], [], []>} : vector<32x256xbf16>, vector<256x256xbf16>, vector<32x256xf32> -> vector<32x256xf32>
    %19 = arith.addf %14, %18 : vector<32x256xf32>
    %cst_17 = arith.constant dense<0.000000e+00> : vector<256xf32>
    %20 = vector.multi_reduction <add>, %19, %cst_17 [0] : vector<32x256xf32> to vector<256xf32>
    %21 = vector.shape_cast %20 : vector<256xf32> to vector<1x256xf32>
    %c0_18 = arith.constant 0 : index
    %c0_19 = arith.constant 0 : index
    %22 = vector.load %arg2[%c0_18, %c0_19] : memref<256x256xf32, #tpu.memory_space<vmem>>, vector<256x256xf32>
    %cst_20 = arith.constant dense<0.000000e+00> : vector<1x256xf32>
    %23 = tpu.matmul %21, %22, %cst_20 {dimension_numbers = #tpu.dot_dimension_numbers<[1], [0], [0], [1], [0, 0, 1, 1], [], []>} : vector<1x256xf32>, vector<256x256xf32>, vector<1x256xf32> -> vector<1x256xf32>
    %cst_21 = arith.constant 0.001953125 : f32
    %24 = vector.broadcast %cst_21 : f32 to vector<1x256xf32>
    %25 = arith.mulf %23, %24 : vector<1x256xf32>
    %26 = vector.broadcast %25 : vector<1x256xf32> to vector<32x256xf32>
    %27 = arith.subf %19, %26 : vector<32x256xf32>
    %28 = arith.mulf %27, %27 : vector<32x256xf32>
    %cst_22 = arith.constant dense<0.000000e+00> : vector<256xf32>
    %29 = vector.multi_reduction <add>, %28, %cst_22 [0] : vector<32x256xf32> to vector<256xf32>
    %30 = vector.shape_cast %29 : vector<256xf32> to vector<1x256xf32>
    %c0_23 = arith.constant 0 : index
    %c0_24 = arith.constant 0 : index
    %31 = vector.load %arg2[%c0_23, %c0_24] : memref<256x256xf32, #tpu.memory_space<vmem>>, vector<256x256xf32>
    %cst_25 = arith.constant dense<0.000000e+00> : vector<1x256xf32>
    %32 = tpu.matmul %30, %31, %cst_25 {dimension_numbers = #tpu.dot_dimension_numbers<[1], [0], [0], [1], [0, 0, 1, 1], [], []>} : vector<1x256xf32>, vector<256x256xf32>, vector<1x256xf32> -> vector<1x256xf32>
    %cst_26 = arith.constant 0.001953125 : f32
    %33 = vector.broadcast %cst_26 : f32 to vector<1x256xf32>
    %34 = arith.mulf %32, %33 : vector<1x256xf32>
    %c0_27 = arith.constant 0 : index
    %c0_28 = arith.constant 0 : index
    %35 = vector.load %arg3[%c0_27, %c0_28] : memref<1x256xf32, #tpu.memory_space<vmem>>, vector<1x256xf32>
    %cst_29 = arith.constant 9.99999974E-6 : f32
    %36 = vector.broadcast %cst_29 : f32 to vector<1x256xf32>
    %37 = arith.addf %34, %36 : vector<1x256xf32>
    %38 = math.rsqrt %37 : vector<1x256xf32>
    %39 = arith.mulf %35, %38 : vector<1x256xf32>
    %40 = vector.broadcast %39 : vector<1x256xf32> to vector<32x256xf32>
    %41 = arith.mulf %27, %40 : vector<32x256xf32>
    %42 = arith.addf %3, %41 : vector<32x256xf32>
    %c0_30 = arith.constant 0 : index
    %c0_31 = arith.constant 0 : index
    %43 = vector.load %arg4[%c0_30, %c0_31] : memref<1x256xf32, #tpu.memory_space<vmem>>, vector<1x256xf32>
    %44 = vector.broadcast %43 : vector<1x256xf32> to vector<32x256xf32>
    %45 = arith.addf %42, %44 : vector<32x256xf32>
    %c0_32 = arith.constant 0 : index
    %c0_33 = arith.constant 0 : index
    %46 = vector.load %arg5[%c0_32, %c0_33] : memref<32x256xf32, #tpu.memory_space<vmem>>, vector<32x256xf32>
    tpu.vector_store %arg5[%c0_32, %c0_33], %45 {strides = array<i32>} : memref<32x256xf32, #tpu.memory_space<vmem>>, vector<32x256xf32>,
    return
  }
}

</mosaic_0001>

<bundles_post_ra>
// kernel: tile.13
= control target key start
LH: loop header
LB: loop body
LE: loop exit
PB: predicated region body
PF: predicated region fallthrough
CT: control target
= control target key end

     0   :  { %s28_s0 = inlined_call_operand.vmem [shape: f32[16], index: 0, kind: input, shape index: {}]   ;;  %s29_s1 = inlined_call_operand.vmem [shape: f32[16,16], index: 1, kind: output, shape index: {}]  }
   0x1   :  { %v4_v0 = vld [vmem:[%s28_s0] ss:$0 sm:$0xff] }
   0x2   :  { %5 = vst [vmem:[%s29_s1] sm:$0xff] %v4_v0 }
   0x3   :  { %8 = vst [vmem:[%s29_s1 + $0x8] sm:$0xff] %v4_v0 }

// kernel: tile.14
= control target key start
LH: loop header
LB: loop body
LE: loop exit
PB: predicated region body
PF: predicated region fallthrough
CT: control target
= control target key end

     0   :  { %s7_s6 = smov 3  ;;  %s21_s9 = smov 3  ;;  %vm4_vm0 = vcmask 130048   ;;  %vm11_vm1 = vcmask 1048448   ;;  %vm18_vm2 = vcmask 917248   ;;  %vm25_vm3 = vcmask 786048   ;;  %s129_s0 = inlined_call_operand.vmem [shape: f32[16,16], index: 0, kind: input, shape index: {}]   ;;  %s130_s1 = inlined_call_operand.vmem [shape: f32[1,256], index: 1, kind: output, shape index: {}]  }
   0x1   :  { %v67_v0 = vld [vmem:[%s129_s0 + $0x7] ss:$8 sm:%s7_s6]   ;;  %s82_s10 = smov 112   ;;  %v69_v1 = vld [vmem:[%s129_s0 + $0x5] ss:$8 sm:%s21_s9]   ;;  %s83_s13 = smov 80  }
   0x2   :  { %9 = vrot.lane.b32.xlu0 %v67_v0, %s82_s10  ;;  %23 = vrot.lane.b32.xlu1 %v69_v1, %s83_s13  ;;  %s14_s14 = smov 3  ;;  %s28_s15 = smov 3  ;;  %vm32_vm4 = vcmask 654848   ;;  %vm39_vm5 = vcmask 523648   ;;  %vm46_vm6 = vcmask 392448   ;;  %vm53_vm7 = vcmask 261248  }
   0x3   :  { %s35_s16 = smov 3  ;;  %v68_v3 = vld [vmem:[%s129_s0 + $0x6] ss:$8 sm:%s14_s14]   ;;  %s84_s21 = smov 48   ;;  %v70_v4 = vld [vmem:[%s129_s0 + $0x4] ss:$8 sm:%s28_s15]  }
   0x4   :  { %v71_v2 = vld [vmem:[%s129_s0 + $0x3] ss:$8 sm:%s35_s16]   ;;  %s42_s24 = smov 3  ;;  %s85_s25 = smov 96  }
   0x5   :  { %37 = vrot.lane.b32.xlu2 %v71_v2, %s84_s21  ;;  %s86_s26 = smov 64   ;;  %s49_s27 = smov 3  ;;  %v72_v5 = vld [vmem:[%s129_s0 + $0x2] ss:$8 sm:%s42_s24]  }
   0x6   :  { %v73_v6 = vld [vmem:[%s129_s0 + $0x1] ss:$8 sm:%s49_s27]   ;;  %s87_s3 = smov 32   ;;  %s88_s4 = smov 16  }
   0x7   :  { %s2_s5 = smov 3 }
   0x8   :  { %v3_v7 = vld [vmem:[%s129_s0] ss:$8 sm:%s2_s5]  }
   0x9   :  { %5 = vst.msk [vmem:[#allocation0] ss:$8 sm:$0x3] %vm4_vm0, %v3_v7  }
   0xa   :  { %16 = vrot.lane.b32.xlu0 %v68_v3, %s85_s25  ;;  %30 = vrot.lane.b32.xlu1 %v70_v4, %s86_s26 }
   0xd   :  { %44 = vrot.lane.b32.xlu2 %v72_v5, %s87_s3 }
  0x12   :  { %51 = vrot.lane.b32.xlu0 %v73_v6, %s88_s4 }
  0x5f   :  { %v38_v8 = vpop.permute.xlu2 %37  }
  0x67   :  { %v45_v9 = vpop.permute.xlu2 %44  }
  0x74   :  { %v10_v10 = vpop.permute.xlu0 %9   ;;  %v24_v11 = vpop.permute.xlu1 %23  }
  0x75   :  { %12 = vst.msk [vmem:[#allocation0] ss:$8 sm:$0x3] %vm11_vm1, %v10_v10  }
  0x7c   :  { %v17_v12 = vpop.permute.xlu0 %16   ;;  %v31_v13 = vpop.permute.xlu1 %30  }
  0x7d   :  { %19 = vst.msk [vmem:[#allocation0] ss:$8 sm:$0x3] %vm18_vm2, %v17_v12  }
  0x7e   :  { %26 = vst.msk [vmem:[#allocation0] ss:$8 sm:$0x3] %vm25_vm3, %v24_v11  }
  0x7f   :  { %33 = vst.msk [vmem:[#allocation0] ss:$8 sm:$0x3] %vm32_vm4, %v31_v13  }
  0x80   :  { %40 = vst.msk [vmem:[#allocation0] ss:$8 sm:$0x3] %vm39_vm5, %v38_v8  }
  0x81   :  { %47 = vst.msk [vmem:[#allocation0] ss:$8 sm:$0x3] %vm46_vm6, %v45_v9  }
  0x84   :  { %v52_v14 = vpop.permute.xlu0 %51  }
  0x85   :  { %54 = vst.msk [vmem:[#allocation0] ss:$8 sm:$0x3] %vm53_vm7, %v52_v14  }
  0x8c   :  { %v57_v15 = vld [vmem:[#allocation0] sm:$0x1]  ;;  %v62_v16 = vld [vmem:[#allocation0 + $0x8] sm:$0x1] }
  0x8d   :  { %60 = vst [vmem:[%s130_s1] sm:$0x1] %v57_v15 }
  0x8e   :  { %74 = vst [vmem:[%s130_s1 + $0x1] sm:$0x1] %v62_v16 }

// kernel: resnet_block_forward.1
= control target key start
LH: loop header
LB: loop body
LE: loop exit
PB: predicated region body
PF: predicated region fallthrough
CT: control target
= control target key end

     0   :  { %vm48_vm0 = vcmask 1046528   ;;  %vm93_vm1 = vcmask 1045504   ;;  %vm1256_vm7 = vcmask 1040384   ;;  %s3253_s1 = inlined_call_operand.vmem [shape: bf16[3,256,256], index: 1, kind: input, shape index: {}]   ;;  %s3254_s0 = inlined_call_operand.vmem [shape: f32[2,18,256], index: 0, kind: input, shape index: {}]   ;;  %s3255_s2 = inlined_call_operand.vmem [shape: f32[256,256], index: 2, kind: input, shape index: {}]   ;;  %s3256_s3 = inlined_call_operand.vmem [shape: f32[1,256], index: 3, kind: input, shape index: {}]   ;;  %s3257_s4 = inlined_call_operand.vmem [shape: f32[1,256], index: 4, kind: input, shape index: {}]   ;;  %s3258_s5 = inlined_call_operand.vmem [shape: f32[32,256], index: 5, kind: output, shape index: {}]  }
   0x1   :  { %v1397_v0 = vld [vmem:[%s3253_s1 + $0x170] sm:$0xf]  ;;  %v1802_v1 = vld [vmem:[%s3253_s1 + $0x174] sm:$0xf0]  ;;  %v1801_v5 = vld [vmem:[%s3253_s1 + $0x174] sm:$0xf] }
   0x2   :  { %v1461_v2 = vld [vmem:[%s3253_s1 + $0x1f0] sm:$0xf]  ;;  %v1398_v3 = vor.u32 %v1802_v1, %v1397_v0  ;;  %v1818_v4 = vld [vmem:[%s3253_s1 + $0x1f4] sm:$0xf0]  ;;  %v1399_v6 = vld [vmem:[%s3253_s1 + $0x178] sm:$0xf0] }
   0x3   :  { %v1462_v7 = vor.u32 %v1818_v4, %v1461_v2  ;;  %v1402_v8 = vor.u32 %v1801_v5, %v1399_v6  ;;  %v1817_v9 = vld [vmem:[%s3253_s1 + $0x1f4] sm:$0xf]  ;;  %v1463_v10 = vld [vmem:[%s3253_s1 + $0x1f8] sm:$0xf0]  ;;  %v1389_v11 = vld [vmem:[%s3253_s1 + $0x160] sm:$0xf] }
   0x4   :  { %355 = vmatpush.bf16.msra.mxu0 %v1398_v3  ;;  %v1466_v12 = vor.u32 %v1817_v9, %v1463_v10  ;;  %v1800_v13 = vld [vmem:[%s3253_s1 + $0x164] sm:$0xf0]  ;;  %v1453_v14 = vld [vmem:[%s3253_s1 + $0x1e0] sm:$0xf]  ;;  %v1799_v18 = vld [vmem:[%s3253_s1 + $0x164] sm:$0xf] }
   0x5   :  { %v1816_v15 = vld [vmem:[%s3253_s1 + $0x1e4] sm:$0xf0]  ;;  %374 = vmatpush.bf16.msra.mxu1 %v1462_v7  ;;  %393 = vmatpush.bf16.msra.mxu2 %v1402_v8  ;;  %v1390_v16 = vor.u32 %v1800_v13, %v1389_v11  ;;  %v1391_v19 = vld [vmem:[%s3253_s1 + $0x168] sm:$0xf0]  ;;  %v1815_v20 = vld [vmem:[%s3253_s1 + $0x1e4] sm:$0xf] }
   0x6   :  { %v1454_v17 = vor.u32 %v1816_v15, %v1453_v14  ;;  %412 = vmatpush.bf16.msra.mxu3 %v1466_v12  ;;  %v1394_v21 = vor.u32 %v1799_v18, %v1391_v19  ;;  %v1455_v22 = vld [vmem:[%s3253_s1 + $0x1e8] sm:$0xf0]  ;;  %v1381_v23 = vld [vmem:[%s3253_s1 + $0x150] sm:$0xf]  ;;  %v1798_v24 = vld [vmem:[%s3253_s1 + $0x154] sm:$0xf0] }
   0x7   :  { %v1458_v25 = vor.u32 %v1815_v20, %v1455_v22  ;;  %v1445_v26 = vld [vmem:[%s3253_s1 + $0x1d0] sm:$0xf]  ;;  %v1814_v27 = vld [vmem:[%s3253_s1 + $0x1d4] sm:$0xf0]  ;;  %v1797_v28 = vld [vmem:[%s3253_s1 + $0x154] sm:$0xf]  ;;  %v1382_v29 = vor.u32 %v1798_v24, %v1381_v23 }
   0x8   :  { %356 = vmatpush.bf16.msra.mxu0 %v1390_v16  ;;  %v1383_v30 = vld [vmem:[%s3253_s1 + $0x158] sm:$0xf0]  ;;  %v1813_v31 = vld [vmem:[%s3253_s1 + $0x1d4] sm:$0xf]  ;;  %v1446_v33 = vor.u32 %v1814_v27, %v1445_v26  ;;  %v1373_v35 = vld [vmem:[%s3253_s1 + $0x140] sm:$0xf] }
   0x9   :  { %v1447_v32 = vld [vmem:[%s3253_s1 + $0x1d8] sm:$0xf0]  ;;  %375 = vmatpush.bf16.msra.mxu1 %v1454_v17  ;;  %394 = vmatpush.bf16.msra.mxu2 %v1394_v21  ;;  %v1386_v34 = vor.u32 %v1797_v28, %v1383_v30  ;;  %v1796_v36 = vld [vmem:[%s3253_s1 + $0x144] sm:$0xf0]  ;;  %v1437_v37 = vld [vmem:[%s3253_s1 + $0x1c0] sm:$0xf] }
   0xa   :  { %413 = vmatpush.bf16.msra.mxu3 %v1458_v25  ;;  %v1450_v38 = vor.u32 %v1813_v31, %v1447_v32  ;;  %v1812_v39 = vld [vmem:[%s3253_s1 + $0x1c4] sm:$0xf0]  ;;  %v1795_v40 = vld [vmem:[%s3253_s1 + $0x144] sm:$0xf]  ;;  %v1375_v41 = vld [vmem:[%s3253_s1 + $0x148] sm:$0xf0]  ;;  %v1374_v44 = vor.u32 %v1796_v36, %v1373_v35 }
   0xb   :  { %v1811_v42 = vld [vmem:[%s3253_s1 + $0x1c4] sm:$0xf]  ;;  %v1439_v43 = vld [vmem:[%s3253_s1 + $0x1c8] sm:$0xf0]  ;;  %v1438_v45 = vor.u32 %v1812_v39, %v1437_v37  ;;  %v1378_v46 = vor.u32 %v1795_v40, %v1375_v41  ;;  %v1365_v47 = vld [vmem:[%s3253_s1 + $0x130] sm:$0xf] }
   0xc   :  { %357 = vmatpush.bf16.msra.mxu0 %v1382_v29  ;;  %v1794_v48 = vld [vmem:[%s3253_s1 + $0x134] sm:$0xf0]  ;;  %v1429_v49 = vld [vmem:[%s3253_s1 + $0x1b0] sm:$0xf]  ;;  %v1442_v50 = vor.u32 %v1811_v42, %v1439_v43  ;;  %v1793_v52 = vld [vmem:[%s3253_s1 + $0x134] sm:$0xf] }
   0xd   :  { %376 = vmatpush.bf16.msra.mxu1 %v1446_v33  ;;  %395 = vmatpush.bf16.msra.mxu2 %v1386_v34  ;;  %v1810_v51 = vld [vmem:[%s3253_s1 + $0x1b4] sm:$0xf0]  ;;  %v1367_v53 = vld [vmem:[%s3253_s1 + $0x138] sm:$0xf0]  ;;  %v1809_v54 = vld [vmem:[%s3253_s1 + $0x1b4] sm:$0xf]  ;;  %v1366_v56 = vor.u32 %v1794_v48, %v1365_v47 }
   0xe   :  { %414 = vmatpush.bf16.msra.mxu3 %v1450_v38  ;;  %v1431_v55 = vld [vmem:[%s3253_s1 + $0x1b8] sm:$0xf0]  ;;  %v1430_v57 = vor.u32 %v1810_v51, %v1429_v49  ;;  %v1370_v58 = vor.u32 %v1793_v52, %v1367_v53  ;;  %v1357_v59 = vld [vmem:[%s3253_s1 + $0x120] sm:$0xf]  ;;  %v1792_v60 = vld [vmem:[%s3253_s1 + $0x124] sm:$0xf0] }
   0xf   :  { %v1421_v61 = vld [vmem:[%s3253_s1 + $0x1a0] sm:$0xf]  ;;  %v1434_v62 = vor.u32 %v1809_v54, %v1431_v55  ;;  %v1808_v63 = vld [vmem:[%s3253_s1 + $0x1a4] sm:$0xf0]  ;;  %v1791_v0 = vld [vmem:[%s3253_s1 + $0x124] sm:$0xf]  ;;  %v1358_v5 = vor.u32 %v1792_v60, %v1357_v59 }
  0x10   :  { %358 = vmatpush.bf16.msra.mxu0 %v1374_v44  ;;  %v1359_v1 = vld [vmem:[%s3253_s1 + $0x128] sm:$0xf0]  ;;  %v1807_v2 = vld [vmem:[%s3253_s1 + $0x1a4] sm:$0xf]  ;;  %v1349_v4 = vld [vmem:[%s3253_s1 + $0x110] sm:$0xf]  ;;  %v1422_v9 = vor.u32 %v1808_v63, %v1421_v61 }
  0x11   :  { %377 = vmatpush.bf16.msra.mxu1 %v1438_v45  ;;  %396 = vmatpush.bf16.msra.mxu2 %v1378_v46  ;;  %v1423_v3 = vld [vmem:[%s3253_s1 + $0x1a8] sm:$0xf0]  ;;  %v1790_v6 = vld [vmem:[%s3253_s1 + $0x114] sm:$0xf0]  ;;  %v1413_v7 = vld [vmem:[%s3253_s1 + $0x190] sm:$0xf]  ;;  %v1362_v10 = vor.u32 %v1791_v0, %v1359_v1 }
  0x12   :  { %415 = vmatpush.bf16.msra.mxu3 %v1442_v50  ;;  %v1806_v8 = vld [vmem:[%s3253_s1 + $0x194] sm:$0xf0]  ;;  %v1789_v11 = vld [vmem:[%s3253_s1 + $0x114] sm:$0xf]  ;;  %v1351_v12 = vld [vmem:[%s3253_s1 + $0x118] sm:$0xf0]  ;;  %v1426_v14 = vor.u32 %v1807_v2, %v1423_v3  ;;  %v1350_v18 = vor.u32 %v1790_v6, %v1349_v4 }
  0x13   :  { %v1805_v13 = vld [vmem:[%s3253_s1 + $0x194] sm:$0xf]  ;;  %v1415_v15 = vld [vmem:[%s3253_s1 + $0x198] sm:$0xf0]  ;;  %v28_v17 = vld [vmem:[%s3254_s0] sm:$0xfe]  ;;  %v1414_v25 = vor.u32 %v1806_v8, %v1413_v7  ;;  %v1354_v26 = vor.u32 %v1789_v11, %v1351_v12 }
  0x14   :  { %359 = vmatpush.bf16.msra.mxu0 %v1366_v56  ;;  %v2056_v16 = vld [vmem:[%s3254_s0 + $0x10] sm:$0xff]  ;;  %v1341_v19 = vld [vmem:[%s3253_s1 + $0x100] sm:$0xf]  ;;  %v1788_v20 = vld [vmem:[%s3253_s1 + $0x104] sm:$0xf0]  ;;  %v49_v23 = vrot.slane %v28_v17, 1  ;;  %v1418_v35 = vor.u32 %v1805_v13, %v1415_v15 }
  0x15   :  { %378 = vmatpush.bf16.msra.mxu1 %v1430_v57  ;;  %397 = vmatpush.bf16.msra.mxu2 %v1370_v58  ;;  %v1405_v21 = vld [vmem:[%s3253_s1 + $0x180] sm:$0xf]  ;;  %v2076_v24 = vld [vmem:[%s3254_s0 + $0x18] sm:$0xff]  ;;  %v50_v27 = vrot.slane %v2056_v16, 1  ;;  %v29_v29 = vld [vmem:[%s3254_s0 + $0x8] sm:$0xfe]  ;;  %v1342_v42 = vor.u32 %v1788_v20, %v1341_v19 }
  0x16   :  { %416 = vmatpush.bf16.msra.mxu3 %v1434_v62  ;;  %v30_v22 = vld [vmem:[%s3254_s0 + $0x20] sm:$0x1]  ;;  %v31_v30 = vld [vmem:[%s3254_s0 + $0x28] sm:$0x1]  ;;  %v52_v32 = vrot.slane %v29_v29, 1  ;;  %v53_v33 = vrot.slane %v2076_v24, 1 }
  0x17   :  { %v55_v28 = vrot.slane %v30_v22, 1  ;;  %v1804_v31 = vld [vmem:[%s3253_s1 + $0x184] sm:$0xf0]  ;;  %v57_v34 = vrot.slane %v31_v30, 1  ;;  %v1787_v36 = vld [vmem:[%s3253_s1 + $0x104] sm:$0xf]  ;;  %v2108_v44 = vsel %vm48_vm0, %v49_v23, %v50_v27 }
  0x18   :  { %360 = vmatpush.bf16.msra.mxu0 %v1358_v5  ;;  %v1343_v37 = vld [vmem:[%s3253_s1 + $0x108] sm:$0xf0]  ;;  %v1803_v38 = vld [vmem:[%s3253_s1 + $0x184] sm:$0xf]  ;;  %v1769_v40 = vld [vmem:[%s3253_s1 + $0x74] sm:$0xf]  ;;  %v1406_v43 = vor.u32 %v1804_v31, %v1405_v21  ;;  %v2120_v49 = vsel %vm48_vm0, %v52_v32, %v53_v33 }
  0x19   :  { %379 = vmatpush.bf16.msra.mxu1 %v1422_v9  ;;  %398 = vmatpush.bf16.msra.mxu2 %v1362_v10  ;;  %v1407_v39 = vld [vmem:[%s3253_s1 + $0x188] sm:$0xf0]  ;;  %v1527_v41 = vld [vmem:[%s3253_s1 + $0x78] sm:$0xf0]  ;;  %3303 = vst [vmem:[#allocation2_spill] sm:$0xff] %v2108_v44  ;;  %v2111_v45 = vsel %vm48_vm0, %v50_v27, %v55_v28  ;;  %v1346_v48 = vor.u32 %v1787_v36, %v1343_v37  ;;  %v2177_v11 = vld [vmem:[%s3254_s0 + $0x40] sm:$0xff] }
  0x1a   :  { %417 = vmatpush.bf16.msra.mxu3 %v1426_v14  ;;  %3304 = vst [vmem:[#allocation3_spill] sm:$0xff] %v2111_v45  ;;  %v1785_v46 = vld [vmem:[%s3253_s1 + $0xf4] sm:$0xf]  ;;  %v1591_v47 = vld [vmem:[%s3253_s1 + $0xf8] sm:$0xf0]  ;;  %v2123_v50 = vsel %vm48_vm0, %v53_v33, %v57_v34  ;;  %v1410_v51 = vor.u32 %v1803_v38, %v1407_v39  ;;  %v1530_v52 = vor.u32 %v1769_v40, %v1527_v41  ;;  %v2203_v23 = vld [vmem:[%s3254_s0 + $0x48] sm:$0xff] }
  0x1b   :  { %3305 = vst [vmem:[#allocation4_spill] sm:$0xff] %v2120_v49  ;;  %v1525_v53 = vld [vmem:[%s3253_s1 + $0x70] sm:$0xf]  ;;  %v1770_v54 = vld [vmem:[%s3253_s1 + $0x74] sm:$0xf0]  ;;  %v158_v56 = vpack.c.bf16 %v2111_v45, %v2108_v44  ;;  %v1594_v57 = vor.u32 %v1785_v46, %v1591_v47  ;;  %v159_v61 = vpack.c.bf16 %v2123_v50, %v2120_v49  ;;  %v60_v33 = vrot.slane %v2177_v11, 1 }
  0x1c   :  { %361 = vmatpush.bf16.msra.mxu0 %v1350_v18  ;;  %3306 = vst [vmem:[#allocation5_spill] sm:$0xff] %v2123_v50  ;;  %v1589_v55 = vld [vmem:[%s3253_s1 + $0xf0] sm:$0xf]  ;;  %v1786_v58 = vld [vmem:[%s3253_s1 + $0xf4] sm:$0xf0]  ;;  %v1526_v0 = vor.u32 %v1770_v54, %v1525_v53  ;;  %v63_v37 = vrot.slane %v2203_v23, 1 }
  0x1d   :  { %380 = vmatpush.bf16.msra.mxu1 %v1414_v25  ;;  %399 = vmatpush.bf16.msra.mxu2 %v1354_v26  ;;  %v1767_v59 = vld [vmem:[%s3253_s1 + $0x64] sm:$0xf]  ;;  %v1519_v60 = vld [vmem:[%s3253_s1 + $0x68] sm:$0xf0]  ;;  %v1517_v1 = vld [vmem:[%s3253_s1 + $0x60] sm:$0xf]  ;;  %v1590_v2 = vor.u32 %v1786_v58, %v1589_v55 }
  0x1e   :  { %418 = vmatpush.bf16.msra.mxu3 %v1418_v35  ;;  %v1783_v62 = vld [vmem:[%s3253_s1 + $0xe4] sm:$0xf]  ;;  %v1583_v63 = vld [vmem:[%s3253_s1 + $0xe8] sm:$0xf0]  ;;  %v1522_v3 = vor.u32 %v1767_v59, %v1519_v60  ;;  %v1768_v4 = vld [vmem:[%s3253_s1 + $0x64] sm:$0xf0] }
  0x1f   :  { %v1581_v5 = vld [vmem:[%s3253_s1 + $0xe0] sm:$0xf]  ;;  %v1784_v6 = vld [vmem:[%s3253_s1 + $0xe4] sm:$0xf0]  ;;  %v1586_v7 = vor.u32 %v1783_v62, %v1583_v63  ;;  %v1765_v8 = vld [vmem:[%s3253_s1 + $0x54] sm:$0xf]  ;;  %v1518_v15 = vor.u32 %v1768_v4, %v1517_v1 }
  0x20   :  { %362 = vmatpush.bf16.msra.mxu0 %v1342_v42  ;;  %v1511_v9 = vld [vmem:[%s3253_s1 + $0x58] sm:$0xf0]  ;;  %v1781_v10 = vld [vmem:[%s3253_s1 + $0xd4] sm:$0xf]  ;;  %v1509_v13 = vld [vmem:[%s3253_s1 + $0x50] sm:$0xf]  ;;  %v1582_v21 = vor.u32 %v1784_v6, %v1581_v5 }
  0x21   :  { %381 = vmatpush.bf16.msra.mxu1 %v1406_v43  ;;  %400 = vmatpush.bf16.msra.mxu2 %v1346_v48  ;;  %v1575_v12 = vld [vmem:[%s3253_s1 + $0xd8] sm:$0xf0]  ;;  %v1766_v14 = vld [vmem:[%s3253_s1 + $0x54] sm:$0xf0]  ;;  %v1573_v17 = vld [vmem:[%s3253_s1 + $0xd0] sm:$0xf]  ;;  %v1514_v22 = vor.u32 %v1765_v8, %v1511_v9 }
  0x22   :  { %419 = vmatpush.bf16.msra.mxu3 %v1410_v51  ;;  %v1782_v18 = vld [vmem:[%s3253_s1 + $0xd4] sm:$0xf0]  ;;  %v32_v19 = vld [vmem:[%s3254_s0 + $0x30] sm:$0xfe]  ;;  %v34_v20 = vld [vmem:[%s3254_s0 + $0x50] sm:$0x1]  ;;  %v1578_v27 = vor.u32 %v1781_v10, %v1575_v12  ;;  %v1510_v35 = vor.u32 %v1766_v14, %v1509_v13 }
  0x23   :  { %363 = vmatmul.bf16.vlgmr.msra.gmra.mxu0 %v158_v56  ;;  %v33_v25 = vld [vmem:[%s3254_s0 + $0x38] sm:$0xfe]  ;;  %v35_v26 = vld [vmem:[%s3254_s0 + $0x58] sm:$0x1]  ;;  %v1763_v28 = vld [vmem:[%s3253_s1 + $0x44] sm:$0xf]  ;;  %v1574_v39 = vor.u32 %v1782_v18, %v1573_v17 }
  0x24   :  { %382 = vmatmul.bf16.vlgmr.msra.gmra.mxu1 %v159_v61  ;;  %401 = vmatmul.bf16.vlgmr.msra.gmra.mxu2 %v158_v56  ;;  %v1503_v29 = vld [vmem:[%s3253_s1 + $0x48] sm:$0xf0]  ;;  %v1779_v30 = vld [vmem:[%s3253_s1 + $0xc4] sm:$0xf]  ;;  %v59_v32 = vrot.slane %v32_v19, 1  ;;  %v65_v34 = vrot.slane %v34_v20, 1 }
  0x25   :  { %629 = vmatpush.bf16.msrb.mxu2 %v1530_v52  ;;  %420 = vmatmul.bf16.vlgmr.msra.gmra.mxu3 %v159_v61  ;;  %v1567_v31 = vld [vmem:[%s3253_s1 + $0xc8] sm:$0xf0]  ;;  %v62_v36 = vrot.slane %v33_v25, 1  ;;  %v67_v38 = vrot.slane %v35_v26, 1  ;;  %v1506_v40 = vor.u32 %v1763_v28, %v1503_v29  ;;  %v1501_v41 = vld [vmem:[%s3253_s1 + $0x40] sm:$0xf] }
  0x26   :  { %648 = vmatpush.bf16.msrb.mxu3 %v1594_v57  ;;  %591 = vmatpush.bf16.msrb.mxu0 %v1526_v0  ;;  %v1764_v42 = vld [vmem:[%s3253_s1 + $0x44] sm:$0xf0]  ;;  %v1565_v43 = vld [vmem:[%s3253_s1 + $0xc0] sm:$0xf]  ;;  %v1570_v46 = vor.u32 %v1779_v30, %v1567_v31  ;;  %v1761_v48 = vld [vmem:[%s3253_s1 + $0x34] sm:$0xf]  ;;  %v2244_v52 = vsel %vm48_vm0, %v59_v32, %v60_v33  ;;  %v2247_v53 = vsel %vm48_vm0, %v60_v33, %v65_v34 }
  0x27   :  { %610 = vmatpush.bf16.msrb.mxu1 %v1590_v2  ;;  %v1780_v47 = vld [vmem:[%s3253_s1 + $0xc4] sm:$0xf0]  ;;  %v1495_v51 = vld [vmem:[%s3253_s1 + $0x38] sm:$0xf0]  ;;  %3307 = vst [vmem:[#allocation6_spill] sm:$0xff] %v2244_v52  ;;  %v1502_v56 = vor.u32 %v1764_v42, %v1501_v41  ;;  %v2256_v57 = vsel %vm48_vm0, %v62_v36, %v63_v37  ;;  %v2259_v58 = vsel %vm48_vm0, %v63_v37, %v67_v38  ;;  %v2871_v49 = vld [vmem:[%s3255_s2 + $0x50] sm:$0xff] }
  0x28   :  { %3308 = vst [vmem:[#allocation7_spill] sm:$0xff] %v2247_v53  ;;  %v1777_v54 = vld [vmem:[%s3253_s1 + $0xb4] sm:$0xf]  ;;  %v1559_v55 = vld [vmem:[%s3253_s1 + $0xb8] sm:$0xf0]  ;;  %v1566_v59 = vor.u32 %v1780_v47, %v1565_v43  ;;  %v1498_v60 = vor.u32 %v1761_v48, %v1495_v51  ;;  %v160_v0 = vpack.c.bf16 %v2247_v53, %v2244_v52  ;;  %v161_v5 = vpack.c.bf16 %v2259_v58, %v2256_v57  ;;  %v2857_v52 = vld [vmem:[%s3255_s2 + $0x68] sm:$0xff] }
  0x29   :  { %630 = vmatpush.bf16.msrb.mxu2 %v1522_v3  ;;  %3309 = vst [vmem:[#allocation8_spill] sm:$0xff] %v2256_v57  ;;  %v1493_v61 = vld [vmem:[%s3253_s1 + $0x30] sm:$0xf]  ;;  %v1762_v62 = vld [vmem:[%s3253_s1 + $0x34] sm:$0xf0]  ;;  %v1562_v1 = vor.u32 %v1777_v54, %v1559_v55  ;;  %v2866_v45 = vld [vmem:[%s3255_s2 + $0x188] sm:$0xff] }
  0x2a   :  { %649 = vmatpush.bf16.msrb.mxu3 %v1586_v7  ;;  %592 = vmatpush.bf16.msrb.mxu0 %v1518_v15  ;;  %3310 = vst [vmem:[#allocation9_spill] sm:$0xff] %v2259_v58  ;;  %v1557_v63 = vld [vmem:[%s3253_s1 + $0xb0] sm:$0xf]  ;;  %v1778_v2 = vld [vmem:[%s3253_s1 + $0xb4] sm:$0xf0]  ;;  %v1494_v8 = vor.u32 %v1762_v62, %v1493_v61  ;;  %v2843_v58 = vld [vmem:[%s3255_s2 + $0x60] sm:$0xff] }
  0x2b   :  { %611 = vmatpush.bf16.msrb.mxu1 %v1582_v21  ;;  %v1759_v3 = vld [vmem:[%s3253_s1 + $0x24] sm:$0xf]  ;;  %v1487_v4 = vld [vmem:[%s3253_s1 + $0x28] sm:$0xf0]  ;;  %v1558_v9 = vor.u32 %v1778_v2, %v1557_v63  ;;  %v1485_v12 = vld [vmem:[%s3253_s1 + $0x20] sm:$0xf] }
  0x2c   :  { %v1775_v6 = vld [vmem:[%s3253_s1 + $0xa4] sm:$0xf]  ;;  %v1551_v7 = vld [vmem:[%s3253_s1 + $0xa8] sm:$0xf0]  ;;  %v1490_v10 = vor.u32 %v1759_v3, %v1487_v4  ;;  %v1760_v13 = vld [vmem:[%s3253_s1 + $0x24] sm:$0xf0] }
  0x2d   :  { %631 = vmatpush.bf16.msrb.mxu2 %v1514_v22  ;;  %v1549_v14 = vld [vmem:[%s3253_s1 + $0xa0] sm:$0xf]  ;;  %v1554_v15 = vor.u32 %v1775_v6, %v1551_v7  ;;  %v1776_v17 = vld [vmem:[%s3253_s1 + $0xa4] sm:$0xf0]  ;;  %v1757_v18 = vld [vmem:[%s3253_s1 + $0x14] sm:$0xf]  ;;  %v1486_v22 = vor.u32 %v1760_v13, %v1485_v12 }
  0x2e   :  { %650 = vmatpush.bf16.msrb.mxu3 %v1578_v27  ;;  %593 = vmatpush.bf16.msrb.mxu0 %v1510_v35  ;;  %v1479_v19 = vld [vmem:[%s3253_s1 + $0x18] sm:$0xf0]  ;;  %v1773_v20 = vld [vmem:[%s3253_s1 + $0x94] sm:$0xf]  ;;  %v1477_v25 = vld [vmem:[%s3253_s1 + $0x10] sm:$0xf]  ;;  %v1550_v26 = vor.u32 %v1776_v17, %v1549_v14 }
  0x2f   :  { %612 = vmatpush.bf16.msrb.mxu1 %v1574_v39  ;;  %v1543_v21 = vld [vmem:[%s3253_s1 + $0x98] sm:$0xf0]  ;;  %v1482_v27 = vor.u32 %v1757_v18, %v1479_v19  ;;  %v1758_v28 = vld [vmem:[%s3253_s1 + $0x14] sm:$0xf0]  ;;  %v1541_v29 = vld [vmem:[%s3253_s1 + $0x90] sm:$0xf] }
  0x30   :  { %v1774_v30 = vld [vmem:[%s3253_s1 + $0x94] sm:$0xf0]  ;;  %v1546_v31 = vor.u32 %v1773_v20, %v1543_v21  ;;  %v1755_v32 = vld [vmem:[%s3253_s1 + $0x4] sm:$0xf]  ;;  %v1471_v33 = vld [vmem:[%s3253_s1 + $0x8] sm:$0xf0]  ;;  %v1478_v38 = vor.u32 %v1758_v28, %v1477_v25 }
  0x31   :  { %632 = vmatpush.bf16.msrb.mxu2 %v1506_v40  ;;  %v1771_v34 = vld [vmem:[%s3253_s1 + $0x84] sm:$0xf]  ;;  %v1535_v35 = vld [vmem:[%s3253_s1 + $0x88] sm:$0xf0]  ;;  %v1833_v36 = vld [vmem:[%s3253_s1 + $0x274] sm:$0xf]  ;;  %v1542_v42 = vor.u32 %v1774_v30, %v1541_v29  ;;  %v1474_v43 = vor.u32 %v1755_v32, %v1471_v33 }
  0x32   :  { %651 = vmatpush.bf16.msrb.mxu3 %v1570_v46  ;;  %594 = vmatpush.bf16.msrb.mxu0 %v1502_v56  ;;  %v1687_v37 = vld [vmem:[%s3253_s1 + $0x278] sm:$0xf0]  ;;  %v1469_v39 = vld [vmem:[%s3253_s1] sm:$0xf]  ;;  %v1849_v40 = vld [vmem:[%s3253_s1 + $0x2f4] sm:$0xf]  ;;  %v1538_v51 = vor.u32 %v1771_v34, %v1535_v35 }
  0x33   :  { %613 = vmatpush.bf16.msrb.mxu1 %v1566_v59  ;;  %368 = vmatmul.bf16.gmra.mxu0 %v160_v0  ;;  %v1751_v41 = vld [vmem:[%s3253_s1 + $0x2f8] sm:$0xf0]  ;;  %v1756_v46 = vld [vmem:[%s3253_s1 + $0x4] sm:$0xf0]  ;;  %v1533_v47 = vld [vmem:[%s3253_s1 + $0x80] sm:$0xf]  ;;  %v1690_v54 = vor.u32 %v1833_v36, %v1687_v37 }
  0x34   :  { %387 = vmatmul.bf16.gmra.mxu1 %v161_v5  ;;  %406 = vmatmul.bf16.gmra.mxu2 %v160_v0  ;;  %v1772_v48 = vld [vmem:[%s3253_s1 + $0x84] sm:$0xf0]  ;;  %v1685_v55 = vld [vmem:[%s3253_s1 + $0x270] sm:$0xf]  ;;  %v1834_v56 = vld [vmem:[%s3253_s1 + $0x274] sm:$0xf0]  ;;  %v1470_v0 = vor.u32 %v1756_v46, %v1469_v39 }
  0x35   :  { %633 = vmatpush.bf16.msrb.mxu2 %v1498_v60  ;;  %425 = vmatmul.bf16.gmra.mxu3 %v161_v5  ;;  %v1749_v59 = vld [vmem:[%s3253_s1 + $0x2f0] sm:$0xf]  ;;  %v1754_v60 = vor.u32 %v1849_v40, %v1751_v41  ;;  %v1850_v61 = vld [vmem:[%s3253_s1 + $0x2f4] sm:$0xf0]  ;;  %v1831_v62 = vld [vmem:[%s3253_s1 + $0x264] sm:$0xf]  ;;  %v1534_v2 = vor.u32 %v1772_v48, %v1533_v47  ;;  %v1686_v4 = vor.u32 %v1834_v56, %v1685_v55 }
  0x36   :  { %652 = vmatpush.bf16.msrb.mxu3 %v1562_v1  ;;  %595 = vmatpush.bf16.msrb.mxu0 %v1494_v8  ;;  %v1679_v63 = vld [vmem:[%s3253_s1 + $0x268] sm:$0xf0]  ;;  %v20_v1 = vld [vmem:[%s3254_s0] sm:$0xff]  ;;  %v1750_v7 = vor.u32 %v1850_v61, %v1749_v59  ;;  %v1848_v14 = vld [vmem:[%s3253_s1 + $0x2e4] sm:$0xf0]  ;;  %v95_v33 = vrot.slane %v2056_v16, 2 }
  0x37   :  { %614 = vmatpush.bf16.msrb.mxu1 %v1558_v9  ;;  %v21_v3 = vld [vmem:[%s3254_s0 + $0x8] sm:$0xff]  ;;  %v1847_v5 = vld [vmem:[%s3253_s1 + $0x2e4] sm:$0xf]  ;;  %v1682_v8 = vor.u32 %v1831_v62, %v1679_v63  ;;  %v1677_v9 = vld [vmem:[%s3253_s1 + $0x260] sm:$0xf]  ;;  %v122_v13 = vpack.c.bf16 %v2056_v16, %v20_v1  ;;  %v98_v34 = vrot.slane %v2076_v24, 2 }
  0x38   :  { %v1743_v6 = vld [vmem:[%s3253_s1 + $0x2e8] sm:$0xf0]  ;;  %v1741_v12 = vld [vmem:[%s3253_s1 + $0x2e0] sm:$0xf]  ;;  %v1671_v17 = vld [vmem:[%s3253_s1 + $0x258] sm:$0xf0]  ;;  %v123_v18 = vpack.c.bf16 %v2076_v24, %v21_v3 }
  0x39   :  { %634 = vmatpush.bf16.msrb.mxu2 %v1490_v10  ;;  %v1832_v10 = vld [vmem:[%s3253_s1 + $0x264] sm:$0xf0]  ;;  %v1746_v19 = vor.u32 %v1847_v5, %v1743_v6  ;;  %v1845_v21 = vld [vmem:[%s3253_s1 + $0x2d4] sm:$0xf]  ;;  %v1742_v25 = vor.u32 %v1848_v14, %v1741_v12  ;;  %v1830_v28 = vld [vmem:[%s3253_s1 + $0x254] sm:$0xf0] }
  0x3a   :  { %653 = vmatpush.bf16.msrb.mxu3 %v1554_v15  ;;  %596 = vmatpush.bf16.msrb.mxu0 %v1486_v22  ;;  %v1829_v15 = vld [vmem:[%s3253_s1 + $0x254] sm:$0xf]  ;;  %v1678_v20 = vor.u32 %v1832_v10, %v1677_v9  ;;  %v1735_v22 = vld [vmem:[%s3253_s1 + $0x2d8] sm:$0xf0]  ;;  %v1733_v29 = vld [vmem:[%s3253_s1 + $0x2d0] sm:$0xf] }
  0x3b   :  { %615 = vmatpush.bf16.msrb.mxu1 %v1550_v26  ;;  %v1674_v26 = vor.u32 %v1829_v15, %v1671_v17  ;;  %v1846_v30 = vld [vmem:[%s3253_s1 + $0x2d4] sm:$0xf0]  ;;  %v1663_v32 = vld [vmem:[%s3253_s1 + $0x248] sm:$0xf0]  ;;  %v1843_v35 = vld [vmem:[%s3253_s1 + $0x2c4] sm:$0xf]  ;;  %v1738_v37 = vor.u32 %v1845_v21, %v1735_v22 }
  0x3c   :  { %v1727_v36 = vld [vmem:[%s3253_s1 + $0x2c8] sm:$0xf0]  ;;  %v1661_v16 = vld [vmem:[%s3253_s1 + $0x240] sm:$0xf]  ;;  %v1828_v24 = vld [vmem:[%s3253_s1 + $0x244] sm:$0xf0]  ;;  %v1734_v40 = vor.u32 %v1846_v30, %v1733_v29 }
  0x3d   :  { %635 = vmatpush.bf16.msrb.mxu2 %v1482_v27  ;;  %v1669_v27 = vld [vmem:[%s3253_s1 + $0x250] sm:$0xf]  ;;  %v1725_v39 = vld [vmem:[%s3253_s1 + $0x2c0] sm:$0xf]  ;;  %v1655_v46 = vld [vmem:[%s3253_s1 + $0x238] sm:$0xf0]  ;;  %v1662_v55 = vor.u32 %v1828_v24, %v1661_v16 }
  0x3e   :  { %654 = vmatpush.bf16.msrb.mxu3 %v1546_v31  ;;  %597 = vmatpush.bf16.msrb.mxu0 %v1478_v38  ;;  %v1827_v31 = vld [vmem:[%s3253_s1 + $0x244] sm:$0xf]  ;;  %v1670_v38 = vor.u32 %v1830_v28, %v1669_v27  ;;  %v79_v48 = vld [vmem:[%s3254_s0 + $0x20] sm:$0x3]  ;;  %v1841_v56 = vld [vmem:[%s3253_s1 + $0x2b4] sm:$0xf] }
  0x3f   :  { %616 = vmatpush.bf16.msrb.mxu1 %v1542_v42  ;;  %v1666_v41 = vor.u32 %v1827_v31, %v1663_v32  ;;  %v1844_v42 = vld [vmem:[%s3253_s1 + $0x2c4] sm:$0xf0]  ;;  %v77_v47 = vld [vmem:[%s3254_s0] sm:$0xfc]  ;;  %v1719_v59 = vld [vmem:[%s3253_s1 + $0x2b8] sm:$0xf0] }
  0x40   :  { %v94_v61 = vrot.slane %v77_v47, 2  ;;  %v100_v62 = vrot.slane %v79_v48, 2  ;;  %v78_v63 = vld [vmem:[%s3254_s0 + $0x8] sm:$0xfc]  ;;  %v1726_v1 = vor.u32 %v1844_v42, %v1725_v39  ;;  %v81_v5 = vld [vmem:[%s3254_s0 + $0x30] sm:$0xfc]  ;;  %v1722_v31 = vor.u32 %v1841_v56, %v1719_v59 }
  0x41   :  { %636 = vmatpush.bf16.msrb.mxu2 %v1474_v43  ;;  %v1825_v43 = vld [vmem:[%s3253_s1 + $0x234] sm:$0xf]  ;;  %v97_v3 = vrot.slane %v78_v63, 2  ;;  %v83_v6 = vld [vmem:[%s3254_s0 + $0x50] sm:$0x3]  ;;  %v25_v15 = vld [vmem:[%s3254_s0 + $0x38] sm:$0xff] }
  0x42   :  { %655 = vmatpush.bf16.msrb.mxu3 %v1538_v51  ;;  %598 = vmatpush.bf16.msrb.mxu0 %v1470_v0  ;;  %v105_v51 = vrot.slane %v2177_v11, 2  ;;  %v80_v0 = vld [vmem:[%s3254_s0 + $0x28] sm:$0x3]  ;;  %v1717_v9 = vld [vmem:[%s3253_s1 + $0x2b0] sm:$0xf]  ;;  %v96_v10 = vsel %vm93_vm1, %v94_v61, %v95_v33  ;;  %v101_v12 = vsel %vm93_vm1, %v95_v33, %v100_v62  ;;  %v110_v14 = vrot.slane %v83_v6, 2 }
  0x43   :  { %617 = vmatpush.bf16.msrb.mxu1 %v1534_v2  ;;  %v1658_v2 = vor.u32 %v1825_v43, %v1655_v46  ;;  %v1842_v17 = vld [vmem:[%s3253_s1 + $0x2b4] sm:$0xf0]  ;;  %v99_v21 = vsel %vm93_vm1, %v97_v3, %v98_v34  ;;  %v1645_v27 = vld [vmem:[%s3253_s1 + $0x220] sm:$0xf]  ;;  %v1824_v33 = vld [vmem:[%s3253_s1 + $0x224] sm:$0xf0]  ;;  %v125_v47 = vpack.c.bf16 %v2203_v23, %v25_v15 }
  0x44   :  { %637 = vmatmul.bf16.vlgmr.msrb.gmra.mxu2 %v122_v13  ;;  %v111_v30 = vsel %vm93_vm1, %v105_v51, %v110_v14  ;;  %v1821_v16 = vld [vmem:[%s3253_s1 + $0x214] sm:$0xf]  ;;  %v82_v24 = vld [vmem:[%s3254_s0 + $0x38] sm:$0xfc]  ;;  %v84_v39 = vld [vmem:[%s3254_s0 + $0x58] sm:$0x3] }
  0x45   :  { %902 = vmatpush.bf16.msra.mxu2 %v1690_v54  ;;  %599 = vmatmul.bf16.vlgmr.msrb.gmra.mxu0 %v122_v13  ;;  %v1730_v54 = vor.u32 %v1843_v35, %v1727_v36  ;;  %v104_v13 = vrot.slane %v81_v5, 2  ;;  %v1840_v35 = vld [vmem:[%s3253_s1 + $0x2a4] sm:$0xf0]  ;;  %v107_v42 = vrot.slane %v82_v24, 2  ;;  %v108_v43 = vrot.slane %v2203_v23, 2  ;;  %3317 = vst [vmem:[#allocation16_spill] sm:$0xff] %v2843_v58 }
  0x46   :  { %921 = vmatpush.bf16.msra.mxu3 %v1754_v60  ;;  %864 = vmatpush.bf16.msra.mxu0 %v1686_v4  ;;  %v1653_v60 = vld [vmem:[%s3253_s1 + $0x230] sm:$0xf]  ;;  %v102_v4 = vrot.slane %v80_v0, 2  ;;  %v112_v46 = vrot.slane %v84_v39, 2  ;;  %v1822_v61 = vld [vmem:[%s3253_s1 + $0x214] sm:$0xf0] }
  0x47   :  { %883 = vmatpush.bf16.msra.mxu1 %v1750_v7  ;;  %656 = vmatmul.bf16.vlgmr.msrb.gmra.mxu3 %v123_v18  ;;  %v24_v7 = vld [vmem:[%s3254_s0 + $0x30] sm:$0xff]  ;;  %v106_v29 = vsel %vm93_vm1, %v104_v13, %v105_v51  ;;  %v1646_v51 = vor.u32 %v1824_v33, %v1645_v27  ;;  %v1838_v0 = vld [vmem:[%s3253_s1 + $0x294] sm:$0xf0]  ;;  %v1835_v5 = vld [vmem:[%s3253_s1 + $0x284] sm:$0xf]  ;;  %3320 = vst [vmem:[#allocation19_spill] sm:$0xff] %v2857_v52 }
  0x48   :  { %618 = vmatmul.bf16.vlgmr.msrb.gmra.mxu1 %v123_v18  ;;  %v1823_v18 = vld [vmem:[%s3253_s1 + $0x224] sm:$0xf]  ;;  %v103_v22 = vsel %vm93_vm1, %v98_v34, %v102_v4  ;;  %v1709_v34 = vld [vmem:[%s3253_s1 + $0x2a0] sm:$0xf]  ;;  %v2538_v36 = vpack.c.bf16 %v111_v30, %v106_v29  ;;  %v113_v56 = vsel %vm93_vm1, %v108_v43, %v112_v46  ;;  %v1701_v62 = vld [vmem:[%s3253_s1 + $0x290] sm:$0xf] }
  0x49   :  { %903 = vmatpush.bf16.msra.mxu2 %v1682_v8  ;;  %v1826_v8 = vld [vmem:[%s3253_s1 + $0x234] sm:$0xf0]  ;;  %v2525_v28 = vpack.c.bf16 %v103_v22, %v99_v21  ;;  %v1710_v59 = vor.u32 %v1840_v35, %v1709_v34  ;;  %v1702_v6 = vor.u32 %v1838_v0, %v1701_v62  ;;  %v1836_v13 = vld [vmem:[%s3253_s1 + $0x284] sm:$0xf0]  ;;  %v2694_v0 = vld [vmem:[%s3255_s2 + $0x1f0] sm:$0xff]  ;;  %3321 = vst [vmem:[#allocation20_spill] sm:$0xff] %v2866_v45 }
  0x4a   :  { %922 = vmatpush.bf16.msra.mxu3 %v1746_v19  ;;  %865 = vmatpush.bf16.msra.mxu0 %v1678_v20  ;;  %v1647_v19 = vld [vmem:[%s3253_s1 + $0x228] sm:$0xf0]  ;;  %v2512_v20 = vpack.c.bf16 %v101_v12, %v96_v10  ;;  %v1654_v32 = vor.u32 %v1826_v8, %v1653_v60  ;;  %v1637_v60 = vld [vmem:[%s3253_s1 + $0x210] sm:$0xf]  ;;  %v1820_v10 = vld [vmem:[%s3253_s1 + $0x204] sm:$0xf0] }
  0x4b   :  { %884 = vmatpush.bf16.msra.mxu1 %v1742_v25  ;;  %v1839_v25 = vld [vmem:[%s3253_s1 + $0x2a4] sm:$0xf]  ;;  %v1638_v4 = vor.u32 %v1822_v61, %v1637_v60  ;;  %v1695_v8 = vld [vmem:[%s3253_s1 + $0x288] sm:$0xf0]  ;;  %v1693_v12 = vld [vmem:[%s3253_s1 + $0x280] sm:$0xf] }
  0x4c   :  { %v1698_v14 = vor.u32 %v1835_v5, %v1695_v8  ;;  %v2675_v60 = vld [vmem:[%s3255_s2 + $0xd8] sm:$0xff]  ;;  %v2739_v8 = vld [vmem:[%s3255_s2 + $0xa0] sm:$0xff]  ;;  %v2848_v53 = vld [vmem:[%s3255_s2 + $0x190] sm:$0xff]  ;;  %3322 = vst [vmem:[#allocation21_spill] sm:$0xff] %v2871_v49 }
  0x4d   :  { %904 = vmatpush.bf16.msra.mxu2 %v1674_v26  ;;  %v1711_v26 = vld [vmem:[%s3253_s1 + $0x2a8] sm:$0xf0]  ;;  %v2684_v62 = vld [vmem:[%s3255_s2 + $0x1f8] sm:$0xff]  ;;  %3318 = vst [vmem:[#allocation17_spill] sm:$0xff] %v2848_v53  ;;  %v2876_v44 = vld [vmem:[%s3255_s2 + $0x180] sm:$0xff] }
  0x4e   :  { %923 = vmatpush.bf16.msra.mxu3 %v1738_v37  ;;  %866 = vmatpush.bf16.msra.mxu0 %v1670_v38  ;;  %v1718_v37 = vor.u32 %v1842_v17, %v1717_v9  ;;  %v1650_v38 = vor.u32 %v1823_v18, %v1647_v19  ;;  %v1714_v48 = vor.u32 %v1839_v25, %v1711_v26  ;;  %v1629_v9 = vld [vmem:[%s3253_s1 + $0x200] sm:$0xf]  ;;  %v2725_v5 = vld [vmem:[%s3255_s2 + $0xb8] sm:$0xff] }
  0x4f   :  { %885 = vmatpush.bf16.msra.mxu1 %v1734_v40  ;;  %v124_v40 = vpack.c.bf16 %v2177_v11, %v24_v7  ;;  %v1703_v11 = vld [vmem:[%s3253_s1 + $0x298] sm:$0xf0]  ;;  %v1630_v15 = vor.u32 %v1820_v10, %v1629_v9  ;;  %v1694_v17 = vor.u32 %v1836_v13, %v1693_v12  ;;  %v2744_v9 = vld [vmem:[%s3255_s2 + $0x1d0] sm:$0xff]  ;;  %v2753_v12 = vld [vmem:[%s3255_s2 + $0xa8] sm:$0xff]  ;;  %3323 = vst [vmem:[#allocation22_spill] sm:$0xff] %v2876_v44 }
  0x51   :  { %905 = vmatpush.bf16.msra.mxu2 %v1666_v41  ;;  %v1639_v41 = vld [vmem:[%s3253_s1 + $0x218] sm:$0xf0] }
  0x52   :  { %924 = vmatpush.bf16.msra.mxu3 %v1730_v54  ;;  %867 = vmatpush.bf16.msra.mxu0 %v1662_v55  ;;  %v1837_v54 = vld [vmem:[%s3253_s1 + $0x294] sm:$0xf]  ;;  %v109_v55 = vsel %vm93_vm1, %v107_v42, %v108_v43  ;;  %v1642_v23 = vor.u32 %v1821_v16, %v1639_v41 }
  0x53   :  { %886 = vmatpush.bf16.msra.mxu1 %v1726_v1  ;;  %v670_v63 = vpack.c.bf16 %v113_v56, %v109_v55  ;;  %v1819_v1 = vld [vmem:[%s3253_s1 + $0x204] sm:$0xf]  ;;  %v1706_v3 = vor.u32 %v1837_v54, %v1703_v11  ;;  %v2659_v55 = vld [vmem:[%s3255_s2 + $0xe8] sm:$0xff] }
  0x54   :  { %642 = vmatmul.bf16.gmra.mxu2 %v124_v40  ;;  %v2654_v11 = vld [vmem:[%s3255_s2 + $0xe0] sm:$0xff] }
  0x55   :  { %906 = vmatpush.bf16.msra.mxu2 %v1658_v2  ;;  %604 = vmatmul.bf16.gmra.mxu0 %v124_v40  ;;  %v1631_v2 = vld [vmem:[%s3253_s1 + $0x208] sm:$0xf0] }
  0x56   :  { %925 = vmatpush.bf16.msra.mxu3 %v1722_v31  ;;  %868 = vmatpush.bf16.msra.mxu0 %v1654_v32  ;;  %v1634_v7 = vor.u32 %v1819_v1, %v1631_v2  ;;  %v2701_v1 = vld [vmem:[%s3255_s2 + $0xc8] sm:$0xff] }
  0x57   :  { %887 = vmatpush.bf16.msra.mxu1 %v1718_v37  ;;  %661 = vmatmul.bf16.gmra.mxu3 %v125_v47  ;;  %v2708_v2 = vld [vmem:[%s3255_s2 + $0x1e8] sm:$0xff] }
  0x58   :  { %623 = vmatmul.bf16.gmra.mxu1 %v125_v47 }
  0x59   :  { %907 = vmatpush.bf16.msra.mxu2 %v1650_v38 }
  0x5a   :  { %926 = vmatpush.bf16.msra.mxu3 %v1714_v48  ;;  %869 = vmatpush.bf16.msra.mxu0 %v1646_v51  ;;  %v2640_v48 = vld [vmem:[%s3255_s2 + $0xf0] sm:$0xff]  ;;  %v2645_v51 = vld [vmem:[%s3255_s2 + $0xf8] sm:$0xff] }
  0x5b   :  { %888 = vmatpush.bf16.msra.mxu1 %v1710_v59 }
  0x5d   :  { %908 = vmatpush.bf16.msra.mxu2 %v1642_v23  ;;  %v2670_v23 = vld [vmem:[%s3255_s2 + $0xd0] sm:$0xff] }
  0x5e   :  { %927 = vmatpush.bf16.msra.mxu3 %v1706_v3  ;;  %870 = vmatpush.bf16.msra.mxu0 %v1638_v4  ;;  %v2713_v3 = vld [vmem:[%s3255_s2 + $0xb0] sm:$0xff]  ;;  %v2718_v4 = vld [vmem:[%s3255_s2 + $0x1e0] sm:$0xff] }
  0x5f   :  { %889 = vmatpush.bf16.msra.mxu1 %v1702_v6 }
  0x61   :  { %909 = vmatpush.bf16.msra.mxu2 %v1634_v7  ;;  %v2734_v7 = vld [vmem:[%s3255_s2 + $0x1d8] sm:$0xff] }
  0x62   :  { %928 = vmatpush.bf16.msra.mxu3 %v1698_v14  ;;  %871 = vmatpush.bf16.msra.mxu0 %v1630_v15  ;;  %v2762_v14 = vld [vmem:[%s3255_s2 + $0x1c8] sm:$0xff]  ;;  %v2767_v15 = vld [vmem:[%s3255_s2 + $0x90] sm:$0xff] }
  0x63   :  { %890 = vmatpush.bf16.msra.mxu1 %v1694_v17  ;;  %v2772_v17 = vld [vmem:[%s3255_s2 + $0x1c0] sm:$0xff] }
  0x64   :  { %910 = vmatmul.bf16.vlgmr.msra.gmra.mxu2 %v2512_v20 }
  0x65   :  { %872 = vmatmul.bf16.vlgmr.msra.gmra.mxu0 %v2512_v20  ;;  %1070 = vmatpush.msrb.mxu2 %v2645_v51 }
  0x66   :  { %1030 = vmatpush.msrb.mxu0 %v2640_v48  ;;  %1090 = vmatpush.msrb.mxu3 %v2684_v62 }
  0x67   :  { %929 = vmatmul.bf16.vlgmr.msra.gmra.mxu3 %v2525_v28  ;;  %1071 = vmatpush.msrb.mxu2 %v2659_v55 }
  0x68   :  { %891 = vmatmul.bf16.vlgmr.msra.gmra.mxu1 %v2525_v28  ;;  %1031 = vmatpush.msrb.mxu0 %v2654_v11 }
  0x69   :  { %1072 = vmatpush.msrb.mxu2 %v2675_v60  ;;  %1050 = vmatpush.msrb.mxu1 %v2694_v0 }
  0x6a   :  { %1032 = vmatpush.msrb.mxu0 %v2670_v23  ;;  %1091 = vmatpush.msrb.mxu3 %v2708_v2 }
  0x6b   :  { %1073 = vmatpush.msrb.mxu2 %v2701_v1  ;;  %1051 = vmatpush.msrb.mxu1 %v2718_v4 }
  0x6c   :  { %1092 = vmatpush.msrb.mxu3 %v2734_v7 }
  0x6d   :  { %1074 = vmatpush.msrb.mxu2 %v2725_v5  ;;  %1052 = vmatpush.msrb.mxu1 %v2744_v9 }
  0x6e   :  { %1093 = vmatpush.msrb.mxu3 %v2762_v14 }
  0x6f   :  { %1075 = vmatpush.msrb.mxu2 %v2753_v12  ;;  %1053 = vmatpush.msrb.mxu1 %v2772_v17 }
  0x74   :  { %915 = vmatmul.bf16.gmra.mxu2 %v2538_v36 }
  0x75   :  { %877 = vmatmul.bf16.gmra.mxu0 %v2538_v36 }
  0x77   :  { %934 = vmatmul.bf16.gmra.mxu3 %v670_v63 }
  0x78   :  { %896 = vmatmul.bf16.gmra.mxu1 %v670_v63  ;;  %v2689_v63 = vld [vmem:[%s3255_s2 + $0xc0] sm:$0xff] }
  0x79   :  { %1033 = vmatpush.msrb.mxu0 %v2689_v63 }
  0x7b   :  { %1034 = vmatpush.msrb.mxu0 %v2713_v3 }
  0x7d   :  { %1035 = vmatpush.msrb.mxu0 %v2739_v8 }
  0x7f   :  { %1036 = vmatpush.msrb.mxu0 %v2767_v15 }
  0xa0   :  { %v364_v18 = vpop.f32.mrf.mxu0 }
  0xa1   :  { %v383_v19 = vpop.f32.mrf.mxu1 }
  0xa2   :  { %v2605_v21 = vadd.f32 %v383_v19, %v364_v18  ;;  %v2781_v19 = vld [vmem:[%s3255_s2 + $0x98] sm:$0xff] }
  0xa3   :  { %1076 = vmatpush.msrb.mxu2 %v2781_v19 }
  0xa7   :  { %v402_v22 = vpop.f32.mrf.mxu2 }
  0xa8   :  { %v421_v25 = vpop.f32.mrf.mxu3  ;;  %v366_v26 = vpop.f32.mrf.mxu0 }
  0xa9   :  { %v2607_v27 = vadd.f32 %v421_v25, %v402_v22  ;;  %v385_v20 = vpop.f32.mrf.mxu1  ;;  %v2788_v22 = vld [vmem:[%s3255_s2 + $0x1b8] sm:$0xff]  ;;  %v2793_v25 = vld [vmem:[%s3255_s2 + $0x80] sm:$0xff] }
  0xaa   :  { %v2609_v29 = vadd.f32 %v385_v20, %v366_v26  ;;  %3311 = vst [vmem:[#allocation10_spill] sm:$0xff] %v2788_v22  ;;  %v2798_v26 = vld [vmem:[%s3255_s2 + $0x1b0] sm:$0xff]  ;;  %1094 = vmatpush.msrb.mxu3 %v2788_v22  ;;  %1037 = vmatpush.msrb.mxu0 %v2793_v25  ;;  %v2805_v20 = vld [vmem:[%s3255_s2 + $0x88] sm:$0xff] }
  0xab   :  { %1054 = vmatpush.msrb.mxu1 %v2798_v26  ;;  %1077 = vmatpush.msrb.mxu2 %v2805_v20 }
  0xaf   :  { %v404_v30 = vpop.f32.mrf.mxu2 }
  0xb0   :  { %v423_v28 = vpop.f32.mrf.mxu3  ;;  %v369_v31 = vpop.f32.mrf.mxu0 }
  0xb1   :  { %v2611_v32 = vadd.f32 %v423_v28, %v404_v30  ;;  %v388_v33 = vpop.f32.mrf.mxu1  ;;  %v2812_v30 = vld [vmem:[%s3255_s2 + $0x1a8] sm:$0xff]  ;;  %v2817_v28 = vld [vmem:[%s3255_s2 + $0x70] sm:$0xff] }
  0xb2   :  { %v2613_v34 = vadd.f32 %v388_v33, %v369_v31  ;;  %3312 = vst [vmem:[#allocation11_spill] sm:$0xff] %v2812_v30  ;;  %v2822_v31 = vld [vmem:[%s3255_s2 + $0x1a0] sm:$0xff]  ;;  %1095 = vmatpush.msrb.mxu3 %v2812_v30  ;;  %1038 = vmatpush.msrb.mxu0 %v2817_v28  ;;  %v2829_v33 = vld [vmem:[%s3255_s2 + $0x78] sm:$0xff]  ;;  %v2968_v30 = vld [vmem:[%s3255_s2 + $0x148] sm:$0xff] }
  0xb3   :  { %3313 = vst [vmem:[#allocation12_spill] sm:$0xff] %v2817_v28  ;;  %1055 = vmatpush.msrb.mxu1 %v2822_v31  ;;  %1078 = vmatpush.msrb.mxu2 %v2829_v33 }
  0xb4   :  { %3314 = vst [vmem:[#allocation13_spill] sm:$0xff] %v2822_v31  ;;  %1039 = vmatpush.msrb.mxu0 %v2843_v58  ;;  %v3039_v31 = vld [vmem:[%s3255_s2 + $0x108] sm:$0xff] }
  0xb5   :  { %3315 = vst [vmem:[#allocation14_spill] sm:$0xff] %v2829_v33  ;;  %1056 = vmatpush.msrb.mxu1 %v2848_v53  ;;  %1079 = vmatpush.msrb.mxu2 %v2857_v52  ;;  %v2885_v52 = vld [vmem:[%s3255_s2 + $0x58] sm:$0xff] }
  0xb6   :  { %1040 = vmatpush.msrb.mxu0 %v2871_v49  ;;  %3324 = vst [vmem:[#allocation23_spill] sm:$0xff] %v2885_v52  ;;  %v2902_v49 = vld [vmem:[%s3255_s2 + $0x170] sm:$0xff]  ;;  %v2942_v53 = vld [vmem:[%s3255_s2 + $0x158] sm:$0xff] }
  0xb7   :  { %v407_v35 = vpop.f32.mrf.mxu2  ;;  %1057 = vmatpush.msrb.mxu1 %v2876_v44  ;;  %1080 = vmatpush.msrb.mxu2 %v2885_v52  ;;  %3327 = vst [vmem:[#allocation26_spill] sm:$0xff] %v2902_v49  ;;  %v2909_v52 = vld [vmem:[%s3255_s2 + $0x48] sm:$0xff] }
  0xb8   :  { %v426_v36 = vpop.f32.mrf.mxu3  ;;  %v2615_v37 = vpop.f32.mrf.mxu0  ;;  %3328 = vst [vmem:[#allocation27_spill] sm:$0xff] %v2909_v52  ;;  %v2916_v44 = vld [vmem:[%s3255_s2 + $0x168] sm:$0xff] }
  0xb9   :  { %v2617_v38 = vadd.f32 %v426_v36, %v407_v35  ;;  %v2619_v16 = vpop.f32.mrf.mxu1  ;;  %v2838_v36 = vld [vmem:[%s3255_s2 + $0x198] sm:$0xff]  ;;  %1058 = vmatpush.msrb.mxu1 %v2902_v49  ;;  %1081 = vmatpush.msrb.mxu2 %v2909_v52  ;;  %3329 = vst [vmem:[#allocation28_spill] sm:$0xff] %v2916_v44 }
  0xba   :  { %3316 = vst [vmem:[#allocation15_spill] sm:$0xff] %v2838_v36  ;;  %1096 = vmatpush.msrb.mxu3 %v2838_v36  ;;  %v2933_v52 = vld [vmem:[%s3255_s2 + $0x38] sm:$0xff] }
  0xbb   :  { %3332 = vst [vmem:[#allocation31_spill] sm:$0xff] %v2933_v52  ;;  %1082 = vmatpush.msrb.mxu2 %v2933_v52  ;;  %v2961_v52 = vld [vmem:[%s3255_s2 + $0x28] sm:$0xff] }
  0xbc   :  { %1097 = vmatpush.msrb.mxu3 %v2866_v45  ;;  %v2897_v45 = vld [vmem:[%s3255_s2 + $0x40] sm:$0xff]  ;;  %3333 = vst [vmem:[#allocation32_spill] sm:$0xff] %v2942_v53 }
  0xbd   :  { %3326 = vst [vmem:[#allocation25_spill] sm:$0xff] %v2897_v45  ;;  %1041 = vmatpush.msrb.mxu0 %v2897_v45  ;;  %v2926_v45 = vld [vmem:[%s3255_s2 + $0x160] sm:$0xff]  ;;  %1083 = vmatpush.msrb.mxu2 %v2961_v52 }
  0xbe   :  { %3331 = vst [vmem:[#allocation30_spill] sm:$0xff] %v2926_v45  ;;  %1059 = vmatpush.msrb.mxu1 %v2926_v45 }
  0xbf   :  { %v2621_v24 = vpop.f32.mrf.mxu2  ;;  %3336 = vst [vmem:[#allocation35_spill] sm:$0xff] %v2961_v52  ;;  %v2985_v52 = vld [vmem:[%s3255_s2 + $0x18] sm:$0xff] }
  0xc0   :  { %v2623_v39 = vpop.f32.mrf.mxu3  ;;  %3337 = vst [vmem:[#allocation36_spill] sm:$0xff] %v2968_v30  ;;  %1084 = vmatpush.msrb.mxu2 %v2985_v52 }
  0xc1   :  { %3340 = vst [vmem:[#allocation39_spill] sm:$0xff] %v2985_v52  ;;  %v3009_v52 = vld [vmem:[%s3255_s2 + $0x8] sm:$0xff] }
  0xc2   :  { %v2625_v40 = vpop.f32.mrf.mxu0  ;;  %3344 = vst [vmem:[#allocation43_spill] sm:$0xff] %v3009_v52  ;;  %1085 = vmatpush.msrb.mxu2 %v3009_v52  ;;  %v3032_v52 = vld [vmem:[%s3255_s2 + $0x110] sm:$0xff] }
  0xc4   :  { %1188 = vmatpush.msra.mxu2 %v2645_v51  ;;  %v601_v51 = vadd.f32 %v2625_v40, %v2605_v21 }
  0xc5   :  { %v2627_v41 = vpop.f32.mrf.mxu1 }
  0xc6   :  { %1189 = vmatpush.msra.mxu2 %v2659_v55 }
  0xc7   :  { %v2629_v42 = vpop.f32.mrf.mxu2 }
  0xc8   :  { %1190 = vmatpush.msra.mxu2 %v2675_v60 }
  0xca   :  { %v2631_v43 = vpop.f32.mrf.mxu3  ;;  %v2633_v46 = vpop.f32.mrf.mxu0  ;;  %1191 = vmatpush.msra.mxu2 %v2701_v1  ;;  %v3348_v1 = vld [vmem:[#allocation10_spill] sm:$0xff] }
  0xcc   :  { %1192 = vmatpush.msra.mxu2 %v2725_v5 }
  0xcd   :  { %v2635_v47 = vpop.f32.mrf.mxu1 }
  0xce   :  { %1193 = vmatpush.msra.mxu2 %v2753_v12  ;;  %v3354_v12 = vld [vmem:[#allocation17_spill] sm:$0xff] }
  0xcf   :  { %v2649_v54 = vpop.f32.mrf.mxu2 }
  0xd0   :  { %1194 = vmatpush.msra.mxu2 %v2781_v19  ;;  %v3356_v19 = vld [vmem:[#allocation19_spill] sm:$0xff] }
  0xd2   :  { %v2661_v56 = vpop.f32.mrf.mxu3  ;;  %v2665_v59 = vpop.f32.mrf.mxu0  ;;  %1195 = vmatpush.msra.mxu2 %v2805_v20 }
  0xd5   :  { %v2677_v61 = vpop.f32.mrf.mxu1 }
  0xd7   :  { %v2727_v6 = vpop.f32.mrf.mxu2 }
  0xda   :  { %v2746_v10 = vpop.f32.mrf.mxu3  ;;  %v2755_v13 = vpop.f32.mrf.mxu0 }
  0xdd   :  { %v2774_v18 = vpop.f32.mrf.mxu1 }
  0xdf   :  { %v2831_v35 = vpop.f32.mrf.mxu2 }
  0xe2   :  { %v2850_v57 = vpop.f32.mrf.mxu3  ;;  %v2859_v50 = vpop.f32.mrf.mxu0 }
  0xe3   :  { %3319 = vst [vmem:[#allocation18_spill] sm:$0xff] %v2850_v57  ;;  %v2892_v57 = vld [vmem:[%s3255_s2 + $0x178] sm:$0xff] }
  0xe4   :  { %3325 = vst [vmem:[#allocation24_spill] sm:$0xff] %v2892_v57  ;;  %1098 = vmatpush.msrb.mxu3 %v2892_v57  ;;  %v2921_v57 = vld [vmem:[%s3255_s2 + $0x30] sm:$0xff] }
  0xe5   :  { %v2878_v36 = vpop.f32.mrf.mxu1  ;;  %3330 = vst [vmem:[#allocation29_spill] sm:$0xff] %v2921_v57  ;;  %1042 = vmatpush.msrb.mxu0 %v2921_v57  ;;  %v2952_v57 = vld [vmem:[%s3255_s2 + $0x150] sm:$0xff] }
  0xe6   :  { %1099 = vmatpush.msrb.mxu3 %v2916_v44  ;;  %v2947_v44 = vld [vmem:[%s3255_s2 + $0x20] sm:$0xff]  ;;  %3335 = vst [vmem:[#allocation34_spill] sm:$0xff] %v2952_v57  ;;  %1060 = vmatpush.msrb.mxu1 %v2952_v57  ;;  %v2992_v57 = vld [vmem:[%s3255_s2 + $0x138] sm:$0xff]  ;;  %v893_v21 = vadd.f32 %v2878_v36, %v2859_v50 }
  0xe7   :  { %v2935_v49 = vpop.f32.mrf.mxu2  ;;  %3334 = vst [vmem:[#allocation33_spill] sm:$0xff] %v2947_v44  ;;  %1043 = vmatpush.msrb.mxu0 %v2947_v44  ;;  %v2978_v44 = vld [vmem:[%s3255_s2 + $0x140] sm:$0xff]  ;;  %v3362_v36 = vld [vmem:[#allocation25_spill] sm:$0xff] }
  0xe8   :  { %1100 = vmatpush.msrb.mxu3 %v2942_v53  ;;  %v2973_v53 = vld [vmem:[%s3255_s2 + $0x10] sm:$0xff]  ;;  %3339 = vst [vmem:[#allocation38_spill] sm:$0xff] %v2978_v44  ;;  %1061 = vmatpush.msrb.mxu1 %v2978_v44  ;;  %v3016_v44 = vld [vmem:[%s3255_s2 + $0x128] sm:$0xff] }
  0xe9   :  { %3338 = vst [vmem:[#allocation37_spill] sm:$0xff] %v2973_v53  ;;  %1044 = vmatpush.msrb.mxu0 %v2973_v53  ;;  %v3002_v53 = vld [vmem:[%s3255_s2 + $0x130] sm:$0xff] }
  0xea   :  { %v2954_v58 = vpop.f32.mrf.mxu3  ;;  %v875_v45 = vpop.f32.mrf.mxu0  ;;  %1101 = vmatpush.msrb.mxu3 %v2968_v30  ;;  %3341 = vst [vmem:[#allocation40_spill] sm:$0xff] %v2992_v57  ;;  %v2997_v30 = vld [vmem:[%s3255_s2] sm:$0xff]  ;;  %1062 = vmatpush.msrb.mxu1 %v3002_v53 }
  0xeb   :  { %3342 = vst [vmem:[#allocation41_spill] sm:$0xff] %v2997_v30  ;;  %1045 = vmatpush.msrb.mxu0 %v2997_v30  ;;  %v3026_v30 = vld [vmem:[%s3255_s2 + $0x118] sm:$0xff] }
  0xec   :  { %3343 = vst [vmem:[#allocation42_spill] sm:$0xff] %v3002_v53  ;;  %1102 = vmatpush.msrb.mxu3 %v2992_v57  ;;  %v3021_v57 = vld [vmem:[%s3255_s2 + $0x120] sm:$0xff] }
  0xed   :  { %v894_v33 = vpop.f32.mrf.mxu1  ;;  %3345 = vst [vmem:[#allocation44_spill] sm:$0xff] %v3016_v44  ;;  %1148 = vmatpush.msra.mxu0 %v2640_v48  ;;  %1063 = vmatpush.msrb.mxu1 %v3021_v57  ;;  %v603_v48 = vadd.f32 %v2633_v46, %v2609_v29  ;;  %v391_v29 = vadd.f32 %v2619_v16, %v2615_v37 }
  0xee   :  { %3346 = vst [vmem:[#allocation45_spill] sm:$0xff] %v3021_v57  ;;  %1103 = vmatpush.msrb.mxu3 %v3016_v44  ;;  %v3046_v44 = vld [vmem:[%s3255_s2 + $0x100] sm:$0xff]  ;;  %v620_v37 = vadd.f32 %v2627_v41, %v601_v51 }
  0xef   :  { %3347 = vst [vmem:[#allocation46_spill] sm:$0xff] %v3026_v30  ;;  %v913_v53 = vpop.f32.mrf.mxu2  ;;  %1149 = vmatpush.msra.mxu0 %v2654_v11  ;;  %1064 = vmatpush.msrb.mxu1 %v3032_v52  ;;  %v895_v11 = vadd.f32 %v894_v33, %v875_v45  ;;  %v622_v46 = vadd.f32 %v2635_v47, %v603_v48  ;;  %v3360_v33 = vld [vmem:[#allocation23_spill] sm:$0xff]  ;;  %v3363_v48 = vld [vmem:[#allocation26_spill] sm:$0xff] }
  0xf0   :  { %1104 = vmatpush.msrb.mxu3 %v3026_v30  ;;  %v606_v30 = vadd.f32 %v2665_v59, %v2613_v34  ;;  %v641_v45 = vadd.f32 %v2649_v54, %v2611_v32  ;;  %v608_v34 = vadd.f32 %v2755_v13, %v391_v29  ;;  %v639_v32 = vadd.f32 %v2629_v42, %v2607_v27  ;;  %v3355_v13 = vld [vmem:[#allocation18_spill] sm:$0xff]  ;;  %v3364_v29 = vld [vmem:[#allocation27_spill] sm:$0xff] }
  0xf1   :  { %1150 = vmatpush.msra.mxu0 %v2670_v23  ;;  %1065 = vmatpush.msrb.mxu1 %v3046_v44  ;;  %v3077_v47 = vadd.f32 %v895_v11, %v622_v46  ;;  %v644_v54 = vadd.f32 %v2727_v6, %v2617_v38  ;;  %v3089_v41 = vadd.f32 %v893_v21, %v620_v37  ;;  %v3365_v46 = vld [vmem:[#allocation24_spill] sm:$0xff]  ;;  %v3366_v21 = vld [vmem:[#allocation29_spill] sm:$0xff]  ;;  %v3368_v37 = vld [vmem:[#allocation31_spill] sm:$0xff] }
  0xf2   :  { %v932_v28 = vpop.f32.mrf.mxu3  ;;  %v878_v57 = vpop.f32.mrf.mxu0  ;;  %1105 = vmatpush.msrb.mxu3 %v3039_v31  ;;  %v625_v16 = vadd.f32 %v2677_v61, %v606_v30  ;;  %v660_v27 = vadd.f32 %v2661_v56, %v641_v45  ;;  %v931_v38 = vadd.f32 %v2954_v58, %v2935_v49  ;;  %v658_v56 = vadd.f32 %v2631_v43, %v639_v32  ;;  %v3350_v43 = vld [vmem:[#allocation13_spill] sm:$0xff] }
  0xf3   :  { %1151 = vmatpush.msra.mxu0 %v2689_v63  ;;  %1168 = vmatpush.msra.mxu1 %v2694_v0  ;;  %v933_v59 = vadd.f32 %v932_v28, %v913_v53  ;;  %v948_v53 = vadd.f32 %v3077_v47, %v3089_v41 }
  0xf4   :  { %1208 = vmatpush.msra.mxu3 %v2684_v62  ;;  %v663_v62 = vadd.f32 %v2746_v10, %v644_v54  ;;  %v3353_v10 = vld [vmem:[#allocation16_spill] sm:$0xff] }
  0xf5   :  { %v897_v22 = vpop.f32.mrf.mxu1  ;;  %1152 = vmatpush.msra.mxu0 %v2713_v3  ;;  %1169 = vmatpush.msra.mxu1 %v2718_v4  ;;  %v3110_v58 = vadd.f32 %v933_v59, %v660_v27  ;;  %v3119_v3 = vadd.f32 %v931_v38, %v658_v56  ;;  %v3373_v59 = vld [vmem:[#allocation32_spill] sm:$0xff]  ;;  %v3375_v27 = vld [vmem:[#allocation38_spill] sm:$0xff] }
  0xf6   :  { %v898_v40 = vadd.f32 %v897_v22, %v878_v57  ;;  %1209 = vmatpush.msra.mxu3 %v2708_v2  ;;  %v429_v57 = vadd.f32 %v2623_v39, %v2621_v24  ;;  %v627_v24 = vadd.f32 %v2774_v18, %v608_v34  ;;  %v3349_v2 = vld [vmem:[#allocation12_spill] sm:$0xff]  ;;  %v3357_v22 = vld [vmem:[#allocation15_spill] sm:$0xff] }
  0xf7   :  { %v916_v50 = vpop.f32.mrf.mxu2  ;;  %1153 = vmatpush.msra.mxu0 %v2739_v8  ;;  %1170 = vmatpush.msra.mxu1 %v2744_v9  ;;  %v3352_v8 = vld [vmem:[#allocation11_spill] sm:$0xff] }
  0xf8   :  { %v3091_v23 = vadd.f32 %v898_v40, %v625_v16  ;;  %1210 = vmatpush.msra.mxu3 %v2734_v7  ;;  %v646_v49 = vadd.f32 %v2831_v35, %v429_v57  ;;  %v3351_v7 = vld [vmem:[#allocation14_spill] sm:$0xff]  ;;  %v3361_v35 = vld [vmem:[#allocation20_spill] sm:$0xff] }
  0xf9   :  { %1154 = vmatpush.msra.mxu0 %v2767_v15  ;;  %1171 = vmatpush.msra.mxu1 %v2772_v17  ;;  %v957_v15 = vadd.f32 %v3110_v58, %v3119_v3  ;;  %v3367_v40 = vld [vmem:[#allocation30_spill] sm:$0xff]  ;;  %v3369_v16 = vld [vmem:[#allocation28_spill] sm:$0xff] }
  0xfa   :  { %v935_v55 = vpop.f32.mrf.mxu3  ;;  %v880_v60 = vpop.f32.mrf.mxu0  ;;  %1211 = vmatpush.msra.mxu3 %v2762_v14  ;;  %v949_v63 = vadd.f32 %v948_v53, %v3091_v23  ;;  %1196 = vmatpush.msra.mxu2 %v3351_v7  ;;  %v665_v14 = vadd.f32 %v3355_v13, %v646_v49  ;;  %v3371_v57 = vld [vmem:[#allocation34_spill] sm:$0xff]  ;;  %v3377_v53 = vld [vmem:[#allocation36_spill] sm:$0xff] }
  0xfb   :  { %v936_v42 = vadd.f32 %v935_v55, %v916_v50  ;;  %1155 = vmatpush.msra.mxu0 %v2793_v25  ;;  %1172 = vmatpush.msra.mxu1 %v2798_v26  ;;  %v3358_v25 = vld [vmem:[#allocation21_spill] sm:$0xff]  ;;  %v3359_v26 = vld [vmem:[#allocation22_spill] sm:$0xff]  ;;  %v3372_v55 = vld [vmem:[#allocation35_spill] sm:$0xff] }
  0xfc   :  { %1212 = vmatpush.msra.mxu3 %v3348_v1  ;;  %1197 = vmatpush.msra.mxu2 %v3356_v19  ;;  %v3370_v50 = vld [vmem:[#allocation33_spill] sm:$0xff]  ;;  %v3381_v49 = vld [vmem:[#allocation40_spill] sm:$0xff] }
  0xfd   :  { %v899_v39 = vpop.f32.mrf.mxu1  ;;  %1156 = vmatpush.msra.mxu0 %v3349_v2  ;;  %1173 = vmatpush.msra.mxu1 %v3350_v43  ;;  %v3121_v4 = vadd.f32 %v936_v42, %v663_v62  ;;  %v3378_v42 = vld [vmem:[#allocation41_spill] sm:$0xff]  ;;  %v3380_v62 = vld [vmem:[#allocation43_spill] sm:$0xff]  ;;  %v3383_v2 = vld [vmem:[#allocation44_spill] sm:$0xff] }
  0xfe   :  { %v900_v61 = vadd.f32 %v899_v39, %v880_v60  ;;  %1213 = vmatpush.msra.mxu3 %v3352_v8  ;;  %1198 = vmatpush.msra.mxu2 %v3360_v33  ;;  %v3374_v60 = vld [vmem:[#allocation37_spill] sm:$0xff]  ;;  %v3376_v39 = vld [vmem:[#allocation39_spill] sm:$0xff] }
  0xff   :  { %v918_v6 = vpop.f32.mrf.mxu2  ;;  %1157 = vmatpush.msra.mxu0 %v3353_v10  ;;  %1174 = vmatpush.msra.mxu1 %v3354_v12  ;;  %v958_v20 = vadd.f32 %v957_v15, %v3121_v4  ;;  %v3382_v1 = vld [vmem:[#allocation45_spill] sm:$0xff] }
 0x100   :  { %v3113_v0 = vadd.f32 %v900_v61, %v627_v24  ;;  %1214 = vmatpush.msra.mxu3 %v3357_v22  ;;  %1199 = vmatpush.msra.mxu2 %v3364_v29  ;;  %v3379_v61 = vld [vmem:[#allocation42_spill] sm:$0xff] }
 0x101   :  { %1158 = vmatpush.msra.mxu0 %v3358_v25  ;;  %1175 = vmatpush.msra.mxu1 %v3359_v26 }
 0x102   :  { %v950_v5 = vadd.f32 %v949_v63, %v3113_v0  ;;  %v937_v9 = vpop.f32.mrf.mxu3  ;;  %1215 = vmatpush.msra.mxu3 %v3361_v35  ;;  %1200 = vmatpush.msra.mxu2 %v3368_v37 }
 0x103   :  { %v938_v18 = vadd.f32 %v937_v9, %v918_v6  ;;  %1159 = vmatpush.msra.mxu0 %v3362_v36  ;;  %1176 = vmatpush.msra.mxu1 %v3363_v48 }
 0x104   :  { %v951_v17 = vrot.slane %v950_v5, 4  ;;  %1216 = vmatpush.msra.mxu3 %v3365_v46  ;;  %1201 = vmatpush.msra.mxu2 %v3372_v55 }
 0x105   :  { %v3136_v28 = vadd.f32 %v938_v18, %v665_v14  ;;  %1160 = vmatpush.msra.mxu0 %v3366_v21  ;;  %1177 = vmatpush.msra.mxu1 %v3367_v40 }
 0x106   :  { %v952_v30 = vadd.f32 %v951_v17, %v950_v5  ;;  %1217 = vmatpush.msra.mxu3 %v3369_v16  ;;  %1202 = vmatpush.msra.mxu2 %v3376_v39  ;;  %v3384_v5 = vld [vmem:[#allocation46_spill] sm:$0xff] }
 0x107   :  { %v959_v11 = vadd.f32 %v958_v20, %v3136_v28  ;;  %1161 = vmatpush.msra.mxu0 %v3370_v50  ;;  %1178 = vmatpush.msra.mxu1 %v3371_v57 }
 0x108   :  { %v953_v51 = vrot.slane %v952_v30, 2  ;;  %1218 = vmatpush.msra.mxu3 %v3373_v59  ;;  %1203 = vmatpush.msra.mxu2 %v3380_v62 }
 0x109   :  { %v960_v34 = vrot.slane %v959_v11, 4  ;;  %1162 = vmatpush.msra.mxu0 %v3374_v60  ;;  %1179 = vmatpush.msra.mxu1 %v3375_v27 }
 0x10a   :  { %v954_v45 = vadd.f32 %v953_v51, %v952_v30  ;;  %1219 = vmatpush.msra.mxu3 %v3377_v53 }
 0x10b   :  { %v961_v32 = vadd.f32 %v960_v34, %v959_v11  ;;  %1163 = vmatpush.msra.mxu0 %v3378_v42  ;;  %1180 = vmatpush.msra.mxu1 %v3379_v61 }
 0x10c   :  { %v955_v54 = vrot.slane %v954_v45, 1  ;;  %1220 = vmatpush.msra.mxu3 %v3381_v49 }
 0x10d   :  { %v962_v24 = vrot.slane %v961_v32, 2  ;;  %1181 = vmatpush.msra.mxu1 %v3382_v1 }
 0x10e   :  { %v956_v38 = vadd.f32 %v955_v54, %v954_v45  ;;  %1221 = vmatpush.msra.mxu3 %v3383_v2 }
 0x10f   :  { %v963_v56 = vadd.f32 %v962_v24, %v961_v32  ;;  %1182 = vmatpush.msra.mxu1 %v3032_v52 }
 0x110   :  { %1046 = vmatmul.f32.vlgmr.msrb.gmra.mxu0 %v956_v38  ;;  %1086 = vmatmul.f32.vlgmr.msrb.gmra.mxu2 %v956_v38 }
 0x111   :  { %v964_v63 = vrot.slane %v963_v56, 1  ;;  %1222 = vmatpush.msra.mxu3 %v3384_v5  ;;  %1183 = vmatpush.msra.mxu1 %v3046_v44 }
 0x113   :  { %v965_v43 = vadd.f32 %v964_v63, %v963_v56  ;;  %1223 = vmatpush.msra.mxu3 %v3039_v31 }
 0x115   :  { %1066 = vmatmul.f32.vlgmr.msrb.gmra.mxu1 %v965_v43  ;;  %1106 = vmatmul.f32.vlgmr.msrb.gmra.mxu3 %v965_v43 }
 0x18d   :  { %v1047_v6 = vpop.f32.mrf.mxu0 }
 0x192   :  { %v1067_v7 = vpop.f32.mrf.mxu1 }
 0x193   :  { %v1068_v8 = vadd.f32 %v1067_v7, %v1047_v6  ;;  %v1087_v15 = vpop.f32.mrf.mxu2 }
 0x195   :  { %v1110_v9 = vmul.f32 0.001953125, %v1068_v8 }
 0x197   :  { %v1112_v10 = vperm.slane %v1110_v9, 0  ;;  %v1230_v9 = vld [vmem:[%s3256_s3] sm:$0x3] }
 0x198   :  { %v1107_v12 = vpop.f32.mrf.mxu3 }
 0x199   :  { %v3168_v13 = vsub.f32 %v3089_v41, %v1112_v10  ;;  %v3171_v14 = vsub.f32 %v3077_v47, %v1112_v10  ;;  %v3174_v52 = vsub.f32 %v3091_v23, %v1112_v10  ;;  %v1108_v17 = vadd.f32 %v1107_v12, %v1087_v15 }
 0x19a   :  { %v3177_v44 = vsub.f32 %v3113_v0, %v1112_v10 }
 0x19b   :  { %v1122_v31 = vmul.f32 %v3168_v13, %v3168_v13  ;;  %v1124_v18 = vmul.f32 %v3171_v14, %v3171_v14  ;;  %v1111_v19 = vmul.f32 0.001953125, %v1108_v17  ;;  %v1126_v41 = vmul.f32 %v3174_v52, %v3174_v52 }
 0x19c   :  { %v1128_v23 = vmul.f32 %v3177_v44, %v3177_v44 }
 0x19d   :  { %v1130_v47 = vadd.f32 %v1124_v18, %v1122_v31  ;;  %v1113_v22 = vperm.slane %v1111_v19, 0  ;;  %v1281_v31 = vld [vmem:[%s3257_s4] sm:$0x3] }
 0x19f   :  { %v1131_v25 = vadd.f32 %v1130_v47, %v1126_v41  ;;  %v3188_v26 = vsub.f32 %v3119_v3, %v1113_v22  ;;  %v3191_v0 = vsub.f32 %v3110_v58, %v1113_v22  ;;  %v3194_v20 = vsub.f32 %v3121_v4, %v1113_v22 }
 0x1a0   :  { %v3197_v33 = vsub.f32 %v3136_v28, %v1113_v22  ;;  %v1283_v41 = vperm.slane %v1281_v31, 0  ;;  %v1284_v47 = vperm.slane %v1281_v31, 1 }
 0x1a1   :  { %v1132_v30 = vadd.f32 %v1131_v25, %v1128_v23  ;;  %v1123_v35 = vmul.f32 %v3188_v26, %v3188_v26  ;;  %v1125_v36 = vmul.f32 %v3191_v0, %v3191_v0  ;;  %v1127_v3 = vmul.f32 %v3194_v20, %v3194_v20 }
 0x1a2   :  { %v1129_v4 = vmul.f32 %v3197_v33, %v3197_v33 }
 0x1a3   :  { %v1133_v48 = vrot.slane %v1132_v30, 4  ;;  %v1139_v51 = vadd.f32 %v1125_v36, %v1123_v35 }
 0x1a5   :  { %v1134_v58 = vadd.f32 %v1133_v48, %v1132_v30  ;;  %v1140_v11 = vadd.f32 %v1139_v51, %v1127_v3  ;;  %v3385_v51 = vld [vmem:[#allocation2_spill] sm:$0xff] }
 0x1a7   :  { %v1135_v29 = vrot.slane %v1134_v58, 2  ;;  %v1141_v46 = vadd.f32 %v1140_v11, %v1129_v4  ;;  %v3386_v4 = vld [vmem:[#allocation4_spill] sm:$0xff] }
 0x1a9   :  { %v1136_v28 = vadd.f32 %v1135_v29, %v1134_v58  ;;  %v1142_v21 = vrot.slane %v1141_v46, 4  ;;  %v3387_v29 = vld [vmem:[#allocation3_spill] sm:$0xff] }
 0x1ab   :  { %v1137_v40 = vrot.slane %v1136_v28, 1  ;;  %v1143_v45 = vadd.f32 %v1142_v21, %v1141_v46  ;;  %v3388_v46 = vld [vmem:[#allocation5_spill] sm:$0xff]  ;;  %v3390_v21 = vld [vmem:[#allocation8_spill] sm:$0xff] }
 0x1ad   :  { %v1138_v34 = vadd.f32 %v1137_v40, %v1136_v28  ;;  %v1144_v37 = vrot.slane %v1143_v45, 2  ;;  %v3389_v28 = vld [vmem:[#allocation6_spill] sm:$0xff]  ;;  %v3391_v40 = vld [vmem:[#allocation7_spill] sm:$0xff] }
 0x1af   :  { %1164 = vmatmul.f32.vlgmr.msra.gmra.mxu0 %v1138_v34  ;;  %1204 = vmatmul.f32.vlgmr.msra.gmra.mxu2 %v1138_v34  ;;  %v1145_v16 = vadd.f32 %v1144_v37, %v1143_v45 }
 0x1b1   :  { %v1146_v50 = vrot.slane %v1145_v16, 1 }
 0x1b3   :  { %v1147_v57 = vadd.f32 %v1146_v50, %v1145_v16 }
 0x1b5   :  { %1184 = vmatmul.f32.vlgmr.msra.gmra.mxu1 %v1147_v57  ;;  %1224 = vmatmul.f32.vlgmr.msra.gmra.mxu3 %v1147_v57 }
 0x22c   :  { %v1165_v32 = vpop.f32.mrf.mxu0 }
 0x232   :  { %v1185_v54 = vpop.f32.mrf.mxu1  ;;  %v1205_v27 = vpop.f32.mrf.mxu2 }
 0x233   :  { %v1186_v55 = vadd.f32 %v1185_v54, %v1165_v32 }
 0x235   :  { %v1228_v59 = vmul.f32 0.001953125, %v1186_v55 }
 0x237   :  { %v1231_v60 = vadd.f32 1e-05, %v1228_v59 }
 0x238   :  { %v1225_v24 = vpop.f32.mrf.mxu3 }
 0x239   :  { %1851 = vrsqrt.f32 %v1231_v60  ;;  %v1226_v38 = vadd.f32 %v1225_v24, %v1205_v27  ;;  %vm1239_vm6 = vweird.f32 %v1231_v60 }
 0x23b   :  { %v1229_v39 = vmul.f32 0.001953125, %v1226_v38 }
 0x23d   :  { %v1232_v53 = vadd.f32 1e-05, %v1229_v39 }
 0x23f   :  { %v1852_v42 = vpop.eup %1851  ;;  %1853 = vrsqrt.f32 %v1232_v53  ;;  %vm1249_vm4 = vweird.f32 %v1232_v53 }
 0x240   :  { %v1234_v61 = vmul.f32 %v1852_v42, %v1231_v60  ;;  %vm1240_vm3 = vweird.f32 %v1852_v42 }
 0x241   :  { %vm1241_vm8 = vmor %vm1239_vm6, %vm1240_vm3 }
 0x242   :  { %v1235_v56 = vmul.f32 %v1852_v42, %v1234_v61 }
 0x244   :  { %v1236_v49 = vmul.f32 0.5, %v1235_v56 }
 0x245   :  { %v1854_v62 = vpop.eup %1853 }
 0x246   :  { %v1244_v63 = vmul.f32 %v1854_v62, %v1232_v53  ;;  %v1237_v2 = vsub.f32 1.5, %v1236_v49  ;;  %vm1250_vm2 = vweird.f32 %v1854_v62 }
 0x247   :  { %vm1251_vm5 = vmor %vm1249_vm4, %vm1250_vm2 }
 0x248   :  { %v1245_v1 = vmul.f32 %v1854_v62, %v1244_v63  ;;  %v1238_v6 = vmul.f32 %v1852_v42, %v1237_v2 }
 0x24a   :  { %v1246_v43 = vmul.f32 0.5, %v1245_v1  ;;  %v1242_v12 = vsel %vm1241_vm8, %v1852_v42, %v1238_v6 }
 0x24c   :  { %v1247_v5 = vsub.f32 1.5, %v1246_v43 }
 0x24e   :  { %v1248_v7 = vmul.f32 %v1854_v62, %v1247_v5 }
 0x250   :  { %v1252_v8 = vsel %vm1251_vm5, %v1854_v62, %v1248_v7 }
 0x251   :  { %v1255_v10 = vrot.slane %v1252_v8, 7 }
 0x253   :  { %v1257_v15 = vsel %vm1256_vm7, %v1242_v12, %v1255_v10 }
 0x254   :  { %v1259_v17 = vmul.f32 %v1257_v15, %v1230_v9 }
 0x256   :  { %v1261_v18 = vperm.slane %v1259_v17, 0  ;;  %v1262_v19 = vperm.slane %v1259_v17, 1 }
 0x258   :  { %v1265_v22 = vmul.f32 %v1261_v18, %v3168_v13  ;;  %v1266_v23 = vmul.f32 %v1262_v19, %v3188_v26  ;;  %v1267_v25 = vmul.f32 %v1261_v18, %v3171_v14  ;;  %v1268_v30 = vmul.f32 %v1262_v19, %v3191_v0 }
 0x259   :  { %v1269_v35 = vmul.f32 %v1261_v18, %v3174_v52  ;;  %v1270_v36 = vmul.f32 %v1262_v19, %v3194_v20  ;;  %v1271_v48 = vmul.f32 %v1261_v18, %v3177_v44  ;;  %v1272_v3 = vmul.f32 %v1262_v19, %v3197_v33  ;;  %v3392_v44 = vld [vmem:[#allocation9_spill] sm:$0xff] }
 0x25a   :  { %v1273_v58 = vadd.f32 %v1265_v22, %v3385_v51  ;;  %v1274_v11 = vadd.f32 %v1266_v23, %v3386_v4  ;;  %v1275_v13 = vadd.f32 %v1267_v25, %v3387_v29  ;;  %v1276_v26 = vadd.f32 %v1268_v30, %v3388_v46 }
 0x25b   :  { %v1277_v14 = vadd.f32 %v1269_v35, %v3389_v28  ;;  %v1278_v0 = vadd.f32 %v1270_v36, %v3390_v21  ;;  %v1279_v52 = vadd.f32 %v1271_v48, %v3391_v40  ;;  %v1280_v37 = vadd.f32 %v1272_v3, %v3392_v44 }
 0x25c   :  { %v1287_v45 = vadd.f32 %v1283_v41, %v1273_v58  ;;  %v1288_v20 = vadd.f32 %v1284_v47, %v1274_v11  ;;  %v1289_v34 = vadd.f32 %v1283_v41, %v1275_v13  ;;  %v1290_v33 = vadd.f32 %v1284_v47, %v1276_v26 }
 0x25d   :  { %v1291_v16 = vadd.f32 %v1283_v41, %v1277_v14  ;;  %v1292_v50 = vadd.f32 %v1284_v47, %v1278_v0  ;;  %v1293_v57 = vadd.f32 %v1283_v41, %v1279_v52  ;;  %v1294_v32 = vadd.f32 %v1284_v47, %v1280_v37 }
 0x25e   :  { %1295 = vst [vmem:[%s3258_s5] sm:$0xff] %v1287_v45 }
 0x25f   :  { %1296 = vst [vmem:[%s3258_s5 + $0x8] sm:$0xff] %v1288_v20 }
 0x260   :  { %1297 = vst [vmem:[%s3258_s5 + $0x10] sm:$0xff] %v1289_v34 }
 0x261   :  { %1298 = vst [vmem:[%s3258_s5 + $0x18] sm:$0xff] %v1290_v33 }
 0x262   :  { %1299 = vst [vmem:[%s3258_s5 + $0x20] sm:$0xff] %v1291_v16 }
 0x263   :  { %1300 = vst [vmem:[%s3258_s5 + $0x28] sm:$0xff] %v1292_v50 }
 0x264   :  { %1301 = vst [vmem:[%s3258_s5 + $0x30] sm:$0xff] %v1293_v57 }
 0x265   :  { %1302 = vst [vmem:[%s3258_s5 + $0x38] sm:$0xff] %v1294_v32 }

</bundles_post_ra>
